<compile_context>
chip_gen: v7x
topology: tpu7x:2x2x1
jax: 0.10.0
libtpu: 0.0.40
codegen_flags: <defaults>
</compile_context>

<pallas_src>
import functools

import jax
import jax.numpy as jnp
from jax.experimental import pallas as pl
from jax.experimental.pallas import tpu as pltpu


# --------------------------- Pallas kernel ---------------------------
def _bottleneck_kernel(x_ref, w1_ref, s1_ref, b1_ref, w2_ref, s2_ref, b2_ref,
                       out_ref, *, TH, H, W, add):
    """One (batch, row-tile) step.

    x_ref  : (1, c1, H+4, W+4) f32   input zero-padded by 2 on each spatial side
    w1_ref : (c_, 9*c1) bf16         conv1 weights folded to matmul form
    s1_ref : (c_, 1)   f32           folded BN1 scale
    b1_ref : (c_, 1)   f32           folded BN1 bias
    w2_ref : (c2, 9*c_) bf16         conv2 weights folded to matmul form
    s2_ref : (c2, 1)   f32
    b2_ref : (c2, 1)   f32
    out_ref: (1, c2, TH*W)           lane-dense output tile (rows r0..r0+TH-1)
    """
    c1 = x_ref.shape[1]
    c_ = w1_ref.shape[0]
    c2 = out_ref.shape[1]

    # First output row of this tile (unpadded coordinates).
    r0 = pl.multiple_of(pl.program_id(1) * TH, TH)

    # Halo window of the padded input needed to recompute a (TH+2)-row slab of
    # the conv1 output: padded rows [r0, r0 + TH + 4).
    x_win = x_ref[0, :, pl.ds(r0, TH + 4), :]          # (c1, TH+4, W+4) f32
    x_win_bf = x_win.astype(jnp.bfloat16)              # cast once (hoisted)

    # ---- conv1: single wide-K matmul via im2col over the 9 taps -------------
    Pe = (TH + 2) * (W + 2)
    taps1 = []
    for dy in range(3):
        for dx in range(3):
            taps1.append(
                x_win_bf[:, dy:dy + TH + 2, dx:dx + W + 2].reshape(c1, Pe))
    patches1 = jnp.concatenate(taps1, axis=0)          # (9*c1, Pe) bf16

    acc1 = jnp.dot(w1_ref[...], patches1,
                   preferred_element_type=jnp.float32)  # (c_, Pe) f32
    y1 = acc1 * s1_ref[...] + b1_ref[...]               # folded eval-mode BN
    y1 = y1 * jax.nn.sigmoid(y1)                        # SiLU (f32 epilogue)
    y1 = y1.reshape(c_, TH + 2, W + 2)

    # Zero the halo positions outside the image: this *is* conv2's SAME
    # zero-padding (no padded scratch, no per-step memset).
    rows = jax.lax.broadcasted_iota(jnp.int32, (TH + 2, W + 2), 0) + (r0 - 1)
    cols = jax.lax.broadcasted_iota(jnp.int32, (TH + 2, W + 2), 1) - 1
    valid = (rows >= 0) & (rows < H) & (cols >= 0) & (cols < W)
    y1 = jnp.where(valid[None, :, :], y1, 0.0)
    y1_bf = y1.astype(jnp.bfloat16)                     # cast once (hoisted)

    # ---- conv2: same single-matmul trick ------------------------------------
    Pi = TH * W
    taps2 = []
    for dy in range(3):
        for dx in range(3):
            taps2.append(y1_bf[:, dy:dy + TH, dx:dx + W].reshape(c_, Pi))
    patches2 = jnp.concatenate(taps2, axis=0)           # (9*c_, Pi) bf16

    acc2 = jnp.dot(w2_ref[...], patches2,
                   preferred_element_type=jnp.float32)  # (c2, Pi) f32
    y2 = acc2 * s2_ref[...] + b2_ref[...]
    y2 = y2 * jax.nn.sigmoid(y2)

    if add:  # shortcut (static: shortcut=True and c1 == c2), f32 add
        y2 = y2 + x_win[:, 2:2 + TH, 2:2 + W].reshape(c2, Pi)

    out_ref[0] = y2.astype(out_ref.dtype)


# --------------------------- wrapper ---------------------------
def _choose_row_tile(H, W, max_lane_elems=4096):
    """Largest row tile TH that divides H, keeps TH*W a multiple of 128 and
    modest in size, with at least 2 spatial grid steps when possible."""
    cands = [t for t in range(1, H)
             if H % t == 0 and (t * W) % 128 == 0 and t * W <= max_lane_elems]
    return max(cands) if cands else H


def bottleneck_pallas(x_nchw, w1, s1, b1, w2, s2, b2, *, shortcut=True):
    """x_nchw: (B, c1, H, W) f32.  w1/w2 in HWIO.  Returns (B, c2, H, W) f32."""
    B, c1, H, W = x_nchw.shape
    c_ = w1.shape[-1]
    c2 = w2.shape[-1]
    add = bool(shortcut and c1 == c2)
    TH = _choose_row_tile(H, W)

    # Zero-pad spatial dims by 2 (one halo per stacked 3x3 SAME conv).
    x_pad2 = jnp.pad(x_nchw, ((0, 0), (0, 0), (2, 2), (2, 2)))

    # Fold weights to (c_out, 9*c_in) matmul form, bf16 for the MXU.
    w1_mat = jnp.transpose(w1, (3, 0, 1, 2)).reshape(c_, 9 * c1).astype(jnp.bfloat16)
    w2_mat = jnp.transpose(w2, (3, 0, 1, 2)).reshape(c2, 9 * c_).astype(jnp.bfloat16)

    s1c = s1.reshape(c_, 1).astype(jnp.float32)
    b1c = b1.reshape(c_, 1).astype(jnp.float32)
    s2c = s2.reshape(c2, 1).astype(jnp.float32)
    b2c = b2.reshape(c2, 1).astype(jnp.float32)

    kernel = functools.partial(_bottleneck_kernel, TH=TH, H=H, W=W, add=add)

    out_flat = pl.pallas_call(
        kernel,
        out_shape=jax.ShapeDtypeStruct((B, c2, H * W), x_nchw.dtype),
        grid=(B, H // TH),
        in_specs=[
            pl.BlockSpec((1, c1, H + 4, W + 4), lambda b, i: (b, 0, 0, 0)),
            pl.BlockSpec((c_, 9 * c1), lambda b, i: (0, 0)),
            pl.BlockSpec((c_, 1), lambda b, i: (0, 0)),
            pl.BlockSpec((c_, 1), lambda b, i: (0, 0)),
            pl.BlockSpec((c2, 9 * c_), lambda b, i: (0, 0)),
            pl.BlockSpec((c2, 1), lambda b, i: (0, 0)),
            pl.BlockSpec((c2, 1), lambda b, i: (0, 0)),
        ],
        out_specs=pl.BlockSpec((1, c2, TH * W), lambda b, i: (b, 0, i)),
        compiler_params=pltpu.CompilerParams(
            dimension_semantics=("parallel", "parallel"),
            vmem_limit_bytes=32 * 1024 * 1024),
    )(x_pad2, w1_mat, s1c, b1c, w2_mat, s2c, b2c)

    return out_flat.reshape(B, c2, H, W)


# ----------------- reference (plain JAX) for checking -----------------
def _conv_bn_silu_ref(x_nchw, w_hwio, scale, bias, mm_dtype):
    y = jax.lax.conv_general_dilated(
        x_nchw.astype(mm_dtype), w_hwio.astype(mm_dtype),
        window_strides=(1, 1), padding="SAME",
        dimension_numbers=("NCHW", "HWIO", "NCHW"),
        preferred_element_type=jnp.float32)
    y = y * scale.reshape(1, -1, 1, 1) + bias.reshape(1, -1, 1, 1)
    return y * jax.nn.sigmoid(y)


def bottleneck_ref(x_nchw, w1, s1, b1, w2, s2, b2, *, shortcut=True,
                   mm_dtype=jnp.float32):
    y = _conv_bn_silu_ref(x_nchw, w1, s1, b1, mm_dtype)
    y = _conv_bn_silu_ref(y, w2, s2, b2, mm_dtype)
    if shortcut and x_nchw.shape[1] == y.shape[1]:
        y = y + x_nchw
    return y


# ----------------------- parameter construction -----------------------
def make_params(key, c1, c2, e=0.5):
    """Deterministic synthetic params; eval-mode BatchNorm folded to scale/bias."""
    c_ = int(c2 * e)
    ks = jax.random.split(key, 10)
    eps = 1e-5

    w1 = jax.random.normal(ks[0], (3, 3, c1, c_), jnp.float32) * 0.2
    g1 = 1.0 + 0.1 * jax.random.normal(ks[1], (c_,), jnp.float32)
    be1 = 0.1 * jax.random.normal(ks[2], (c_,), jnp.float32)
    rm1 = 0.1 * jax.random.normal(ks[3], (c_,), jnp.float32)
    rv1 = 1.0 + 0.1 * jax.random.uniform(ks[4], (c_,), jnp.float32)
    s1 = g1 / jnp.sqrt(rv1 + eps)
    b1 = be1 - rm1 * s1

    w2 = jax.random.normal(ks[5], (3, 3, c_, c2), jnp.float32) * 0.2
    g2 = 1.0 + 0.1 * jax.random.normal(ks[6], (c2,), jnp.float32)
    be2 = 0.1 * jax.random.normal(ks[7], (c2,), jnp.float32)
    rm2 = 0.1 * jax.random.normal(ks[8], (c2,), jnp.float32)
    rv2 = 1.0 + 0.1 * jax.random.uniform(ks[9], (c2,), jnp.float32)
    s2 = g2 / jnp.sqrt(rv2 + eps)
    b2 = be2 - rm2 * s2

    return w1, s1, b1, w2, s2, b2


if __name__ == "__main__":
    key = jax.random.PRNGKey(0)
    B, C, H, W = 2, 4, 16, 16          # c1 == c2 == 4 -> shortcut active, c_ = 2
    kx, kp = jax.random.split(key)

    x = jax.random.normal(kx, (B, C, H, W), jnp.float32)   # NCHW, like PyTorch
    params = make_params(kp, C, C, e=0.5)

    out = jax.block_until_ready(bottleneck_pallas(x, *params, shortcut=True))
    assert out.shape == (B, C, H, W)

    # Tight check against a reference using the same bf16 matmul inputs
    # (validates the kernel structure / tiling / masking logic).
    ref_bf16 = bottleneck_ref(x, *params, shortcut=True, mm_dtype=jnp.bfloat16)
    err_bf16 = float(jnp.max(jnp.abs(out - ref_bf16)))
    assert err_bf16 < 1e-2, f"bf16-matched max abs err = {err_bf16}"

    # Loose check against the pure-f32 module semantics (bf16 quantization band).
    ref_f32 = bottleneck_ref(x, *params, shortcut=True, mm_dtype=jnp.float32)
    err_f32 = float(jnp.max(jnp.abs(out - ref_f32)))
    assert err_f32 < 1e-1, f"f32 max abs err = {err_f32}"

    print("KERNEL_OK")
</pallas_src>

<mosaic_0001>
module attributes {stable_mosaic.version = 11 : i64} {
  func.func @_bottleneck_kernel(%arg0: i32, %arg1: i32, %arg2: memref<1x4x20x20xf32, #tpu.memory_space<vmem>>, %arg3: memref<2x36xbf16, #tpu.memory_space<vmem>>, %arg4: memref<2x1xf32, #tpu.memory_space<vmem>>, %arg5: memref<2x1xf32, #tpu.memory_space<vmem>>, %arg6: memref<4x18xbf16, #tpu.memory_space<vmem>>, %arg7: memref<4x1xf32, #tpu.memory_space<vmem>>, %arg8: memref<4x1xf32, #tpu.memory_space<vmem>>, %arg9: memref<1x4x128xf32, #tpu.memory_space<vmem>>) attributes {dimension_semantics = [#tpu.dimension_semantics<parallel>, #tpu.dimension_semantics<parallel>], iteration_bounds = array<i64: 2, 2>, scalar_prefetch = 0 : i64, scratch_operands = 0 : i64, tpu.core_type = #tpu.core_type<tc>, window_params = [{transform_indices = @transform_0, window_bounds = array<i64: 1, 4, 20, 20>}, {pipeline_mode = #tpu.pipeline_mode<synchronous>, transform_indices = @transform_1, window_bounds = array<i64: 2, 36>}, {pipeline_mode = #tpu.pipeline_mode<synchronous>, transform_indices = @transform_2, window_bounds = array<i64: 2, 1>}, {pipeline_mode = #tpu.pipeline_mode<synchronous>, transform_indices = @transform_3, window_bounds = array<i64: 2, 1>}, {pipeline_mode = #tpu.pipeline_mode<synchronous>, transform_indices = @transform_4, window_bounds = array<i64: 4, 18>}, {pipeline_mode = #tpu.pipeline_mode<synchronous>, transform_indices = @transform_5, window_bounds = array<i64: 4, 1>}, {pipeline_mode = #tpu.pipeline_mode<synchronous>, transform_indices = @transform_6, window_bounds = array<i64: 4, 1>}, {transform_indices = @transform_7, window_bounds = array<i64: 1, 4, 128>}]} {
    %c8_i32 = arith.constant 8 : i32
    %0 = arith.muli %arg1, %c8_i32 : i32
    %1 = tpu.assume_multiple %0, 8 : i32
    %c0 = arith.constant 0 : index
    %c0_0 = arith.constant 0 : index
    %2 = arith.index_cast %1 : i32 to index
    %c0_1 = arith.constant 0 : index
    %3 = vector.load %arg2[%c0, %c0_0, %2, %c0_1] : memref<1x4x20x20xf32, #tpu.memory_space<vmem>>, vector<1x4x12x20xf32>
    %4 = vector.shape_cast %3 : vector<1x4x12x20xf32> to vector<4x12x20xf32>
    %5 = arith.truncf %4 : vector<4x12x20xf32> to vector<4x12x20xbf16>
    %6 = vector.extract_strided_slice %5 {offsets = [0, 0, 0], sizes = [4, 10, 18], strides = [1, 1, 1]} : vector<4x12x20xbf16> to vector<4x10x18xbf16>
    %7 = vector.shape_cast %6 : vector<4x10x18xbf16> to vector<4x180xbf16>
    %8 = vector.extract_strided_slice %5 {offsets = [0, 0, 1], sizes = [4, 10, 18], strides = [1, 1, 1]} : vector<4x12x20xbf16> to vector<4x10x18xbf16>
    %9 = vector.shape_cast %8 : vector<4x10x18xbf16> to vector<4x180xbf16>
    %10 = vector.extract_strided_slice %5 {offsets = [0, 0, 2], sizes = [4, 10, 18], strides = [1, 1, 1]} : vector<4x12x20xbf16> to vector<4x10x18xbf16>
    %11 = vector.shape_cast %10 : vector<4x10x18xbf16> to vector<4x180xbf16>
    %12 = vector.extract_strided_slice %5 {offsets = [0, 1, 0], sizes = [4, 10, 18], strides = [1, 1, 1]} : vector<4x12x20xbf16> to vector<4x10x18xbf16>
    %13 = vector.shape_cast %12 : vector<4x10x18xbf16> to vector<4x180xbf16>
    %14 = vector.extract_strided_slice %5 {offsets = [0, 1, 1], sizes = [4, 10, 18], strides = [1, 1, 1]} : vector<4x12x20xbf16> to vector<4x10x18xbf16>
    %15 = vector.shape_cast %14 : vector<4x10x18xbf16> to vector<4x180xbf16>
    %16 = vector.extract_strided_slice %5 {offsets = [0, 1, 2], sizes = [4, 10, 18], strides = [1, 1, 1]} : vector<4x12x20xbf16> to vector<4x10x18xbf16>
    %17 = vector.shape_cast %16 : vector<4x10x18xbf16> to vector<4x180xbf16>
    %18 = vector.extract_strided_slice %5 {offsets = [0, 2, 0], sizes = [4, 10, 18], strides = [1, 1, 1]} : vector<4x12x20xbf16> to vector<4x10x18xbf16>
    %19 = vector.shape_cast %18 : vector<4x10x18xbf16> to vector<4x180xbf16>
    %20 = vector.extract_strided_slice %5 {offsets = [0, 2, 1], sizes = [4, 10, 18], strides = [1, 1, 1]} : vector<4x12x20xbf16> to vector<4x10x18xbf16>
    %21 = vector.shape_cast %20 : vector<4x10x18xbf16> to vector<4x180xbf16>
    %22 = vector.extract_strided_slice %5 {offsets = [0, 2, 2], sizes = [4, 10, 18], strides = [1, 1, 1]} : vector<4x12x20xbf16> to vector<4x10x18xbf16>
    %23 = vector.shape_cast %22 : vector<4x10x18xbf16> to vector<4x180xbf16>
    %24 = tpu.concatenate %7, %9, %11, %13, %15, %17, %19, %21, %23 in 0 : vector<4x180xbf16>, vector<4x180xbf16>, vector<4x180xbf16>, vector<4x180xbf16>, vector<4x180xbf16>, vector<4x180xbf16>, vector<4x180xbf16>, vector<4x180xbf16>, vector<4x180xbf16> -> vector<36x180xbf16>
    %c0_2 = arith.constant 0 : index
    %c0_3 = arith.constant 0 : index
    %25 = vector.load %arg3[%c0_2, %c0_3] : memref<2x36xbf16, #tpu.memory_space<vmem>>, vector<2x36xbf16>
    %cst = arith.constant dense<0.000000e+00> : vector<2x180xf32>
    %26 = tpu.matmul %25, %24, %cst {dimension_numbers = #tpu.dot_dimension_numbers<[1], [0], [0], [1], [0, 0, 1, 1], [], []>} : vector<2x36xbf16>, vector<36x180xbf16>, vector<2x180xf32> -> vector<2x180xf32>
    %c0_4 = arith.constant 0 : index
    %c0_5 = arith.constant 0 : index
    %27 = vector.load %arg4[%c0_4, %c0_5] : memref<2x1xf32, #tpu.memory_space<vmem>>, vector<2x1xf32>
    %28 = vector.broadcast %27 : vector<2x1xf32> to vector<2x180xf32>
    %29 = arith.mulf %26, %28 : vector<2x180xf32>
    %c0_6 = arith.constant 0 : index
    %c0_7 = arith.constant 0 : index
    %30 = vector.load %arg5[%c0_6, %c0_7] : memref<2x1xf32, #tpu.memory_space<vmem>>, vector<2x1xf32>
    %31 = vector.broadcast %30 : vector<2x1xf32> to vector<2x180xf32>
    %32 = arith.addf %29, %31 : vector<2x180xf32>
    %33 = arith.negf %32 : vector<2x180xf32>
    %34 = math.exp %33 : vector<2x180xf32>
    %cst_8 = arith.constant 1.000000e+00 : f32
    %35 = vector.broadcast %cst_8 : f32 to vector<2x180xf32>
    %36 = arith.addf %35, %34 : vector<2x180xf32>
    %37 = arith.divf %35, %36 : vector<2x180xf32>
    %38 = arith.mulf %32, %37 : vector<2x180xf32>
    %39 = vector.shape_cast %38 : vector<2x180xf32> to vector<2x10x18xf32>
    %40 = tpu.iota {dimensions = array<i32: 0>} : vector<10x18xi32>
    %c1_i32 = arith.constant 1 : i32
    %41 = arith.subi %1, %c1_i32 : i32
    %42 = vector.broadcast %41 : i32 to vector<10x18xi32>
    %43 = arith.addi %40, %42 : vector<10x18xi32>
    %44 = tpu.iota {dimensions = array<i32: 1>} : vector<10x18xi32>
    %c1_i32_9 = arith.constant 1 : i32
    %45 = vector.broadcast %c1_i32_9 : i32 to vector<10x18xi32>
    %46 = arith.subi %44, %45 : vector<10x18xi32>
    %c0_i32 = arith.constant 0 : i32
    %47 = vector.broadcast %c0_i32 : i32 to vector<10x18xi32>
    %48 = arith.cmpi sge, %43, %47 : vector<10x18xi32>
    %c16_i32 = arith.constant 16 : i32
    %49 = vector.broadcast %c16_i32 : i32 to vector<10x18xi32>
    %50 = arith.cmpi slt, %43, %49 : vector<10x18xi32>
    %51 = arith.andi %48, %50 : vector<10x18xi1>
    %c0_i32_10 = arith.constant 0 : i32
    %52 = vector.broadcast %c0_i32_10 : i32 to vector<10x18xi32>
    %53 = arith.cmpi sge, %46, %52 : vector<10x18xi32>
    %54 = arith.andi %51, %53 : vector<10x18xi1>
    %c16_i32_11 = arith.constant 16 : i32
    %55 = vector.broadcast %c16_i32_11 : i32 to vector<10x18xi32>
    %56 = arith.cmpi slt, %46, %55 : vector<10x18xi32>
    %57 = arith.andi %54, %56 : vector<10x18xi1>
    %58 = vector.shape_cast %57 : vector<10x18xi1> to vector<1x10x18xi1>
    %cst_12 = arith.constant 0.000000e+00 : f32
    %59 = vector.shape_cast %58 : vector<1x10x18xi1> to vector<1x10x18xi1>
    %60 = vector.broadcast %59 : vector<1x10x18xi1> to vector<2x10x18xi1>
    %61 = vector.broadcast %cst_12 : f32 to vector<2x10x18xf32>
    %62 = arith.select %60, %39, %61 : vector<2x10x18xi1>, vector<2x10x18xf32>
    %63 = arith.truncf %62 : vector<2x10x18xf32> to vector<2x10x18xbf16>
    %64 = vector.extract_strided_slice %63 {offsets = [0, 0, 0], sizes = [2, 8, 16], strides = [1, 1, 1]} : vector<2x10x18xbf16> to vector<2x8x16xbf16>
    %65 = vector.shape_cast %64 : vector<2x8x16xbf16> to vector<2x128xbf16>
    %66 = vector.extract_strided_slice %63 {offsets = [0, 0, 1], sizes = [2, 8, 16], strides = [1, 1, 1]} : vector<2x10x18xbf16> to vector<2x8x16xbf16>
    %67 = vector.shape_cast %66 : vector<2x8x16xbf16> to vector<2x128xbf16>
    %68 = vector.extract_strided_slice %63 {offsets = [0, 0, 2], sizes = [2, 8, 16], strides = [1, 1, 1]} : vector<2x10x18xbf16> to vector<2x8x16xbf16>
    %69 = vector.shape_cast %68 : vector<2x8x16xbf16> to vector<2x128xbf16>
    %70 = vector.extract_strided_slice %63 {offsets = [0, 1, 0], sizes = [2, 8, 16], strides = [1, 1, 1]} : vector<2x10x18xbf16> to vector<2x8x16xbf16>
    %71 = vector.shape_cast %70 : vector<2x8x16xbf16> to vector<2x128xbf16>
    %72 = vector.extract_strided_slice %63 {offsets = [0, 1, 1], sizes = [2, 8, 16], strides = [1, 1, 1]} : vector<2x10x18xbf16> to vector<2x8x16xbf16>
    %73 = vector.shape_cast %72 : vector<2x8x16xbf16> to vector<2x128xbf16>
    %74 = vector.extract_strided_slice %63 {offsets = [0, 1, 2], sizes = [2, 8, 16], strides = [1, 1, 1]} : vector<2x10x18xbf16> to vector<2x8x16xbf16>
    %75 = vector.shape_cast %74 : vector<2x8x16xbf16> to vector<2x128xbf16>
    %76 = vector.extract_strided_slice %63 {offsets = [0, 2, 0], sizes = [2, 8, 16], strides = [1, 1, 1]} : vector<2x10x18xbf16> to vector<2x8x16xbf16>
    %77 = vector.shape_cast %76 : vector<2x8x16xbf16> to vector<2x128xbf16>
    %78 = vector.extract_strided_slice %63 {offsets = [0, 2, 1], sizes = [2, 8, 16], strides = [1, 1, 1]} : vector<2x10x18xbf16> to vector<2x8x16xbf16>
    %79 = vector.shape_cast %78 : vector<2x8x16xbf16> to vector<2x128xbf16>
    %80 = vector.extract_strided_slice %63 {offsets = [0, 2, 2], sizes = [2, 8, 16], strides = [1, 1, 1]} : vector<2x10x18xbf16> to vector<2x8x16xbf16>
    %81 = vector.shape_cast %80 : vector<2x8x16xbf16> to vector<2x128xbf16>
    %82 = tpu.concatenate %65, %67, %69, %71, %73, %75, %77, %79, %81 in 0 : vector<2x128xbf16>, vector<2x128xbf16>, vector<2x128xbf16>, vector<2x128xbf16>, vector<2x128xbf16>, vector<2x128xbf16>, vector<2x128xbf16>, vector<2x128xbf16>, vector<2x128xbf16> -> vector<18x128xbf16>
    %c0_13 = arith.constant 0 : index
    %c0_14 = arith.constant 0 : index
    %83 = vector.load %arg6[%c0_13, %c0_14] : memref<4x18xbf16, #tpu.memory_space<vmem>>, vector<4x18xbf16>
    %cst_15 = arith.constant dense<0.000000e+00> : vector<4x128xf32>
    %84 = tpu.matmul %83, %82, %cst_15 {dimension_numbers = #tpu.dot_dimension_numbers<[1], [0], [0], [1], [0, 0, 1, 1], [], []>} : vector<4x18xbf16>, vector<18x128xbf16>, vector<4x128xf32> -> vector<4x128xf32>
    %c0_16 = arith.constant 0 : index
    %c0_17 = arith.constant 0 : index
    %85 = vector.load %arg7[%c0_16, %c0_17] : memref<4x1xf32, #tpu.memory_space<vmem>>, vector<4x1xf32>
    %86 = vector.broadcast %85 : vector<4x1xf32> to vector<4x128xf32>
    %87 = arith.mulf %84, %86 : vector<4x128xf32>
    %c0_18 = arith.constant 0 : index
    %c0_19 = arith.constant 0 : index
    %88 = vector.load %arg8[%c0_18, %c0_19] : memref<4x1xf32, #tpu.memory_space<vmem>>, vector<4x1xf32>
    %89 = vector.broadcast %88 : vector<4x1xf32> to vector<4x128xf32>
    %90 = arith.addf %87, %89 : vector<4x128xf32>
    %91 = arith.negf %90 : vector<4x128xf32>
    %92 = math.exp %91 : vector<4x128xf32>
    %cst_20 = arith.constant 1.000000e+00 : f32
    %93 = vector.broadcast %cst_20 : f32 to vector<4x128xf32>
    %94 = arith.addf %93, %92 : vector<4x128xf32>
    %95 = arith.divf %93, %94 : vector<4x128xf32>
    %96 = arith.mulf %90, %95 : vector<4x128xf32>
    %97 = vector.extract_strided_slice %4 {offsets = [0, 2, 2], sizes = [4, 8, 16], strides = [1, 1, 1]} : vector<4x12x20xf32> to vector<4x8x16xf32>
    %98 = vector.shape_cast %97 : vector<4x8x16xf32> to vector<4x128xf32>
    %99 = arith.addf %96, %98 : vector<4x128xf32>
    %c0_21 = arith.constant 0 : index
    %c0_22 = arith.constant 0 : index
    %c0_23 = arith.constant 0 : index
    %100 = vector.load %arg9[%c0_21, %c0_22, %c0_23] : memref<1x4x128xf32, #tpu.memory_space<vmem>>, vector<1x4x128xf32>
    %101 = vector.shape_cast %100 : vector<1x4x128xf32> to vector<4x128xf32>
    %102 = vector.shape_cast %99 : vector<4x128xf32> to vector<1x4x128xf32>
    tpu.vector_store %arg9[%c0_21, %c0_22, %c0_23], %102 {strides = array<i32>} : memref<1x4x128xf32, #tpu.memory_space<vmem>>, vector<1x4x128xf32>,
    return
  }
  func.func @transform_0(%arg0: i32, %arg1: i32) -> (i32, i32, i32, i32) {
    %c0_i32 = arith.constant 0 : i32
    %c0_i32_0 = arith.constant 0 : i32
    %c0_i32_1 = arith.constant 0 : i32
    %c0_i32_2 = arith.constant 0 : i32
    return %arg0, %c0_i32, %c0_i32_0, %c0_i32_1 : i32, i32, i32, i32
  }
  func.func @transform_1(%arg0: i32, %arg1: i32) -> (i32, i32) {
    %c0_i32 = arith.constant 0 : i32
    %c0_i32_0 = arith.constant 0 : i32
    %c0_i32_1 = arith.constant 0 : i32
    return %c0_i32, %c0_i32_0 : i32, i32
  }
  func.func @transform_2(%arg0: i32, %arg1: i32) -> (i32, i32) {
    %c0_i32 = arith.constant 0 : i32
    %c0_i32_0 = arith.constant 0 : i32
    %c0_i32_1 = arith.constant 0 : i32
    return %c0_i32, %c0_i32_0 : i32, i32
  }
  func.func @transform_3(%arg0: i32, %arg1: i32) -> (i32, i32) {
    %c0_i32 = arith.constant 0 : i32
    %c0_i32_0 = arith.constant 0 : i32
    %c0_i32_1 = arith.constant 0 : i32
    return %c0_i32, %c0_i32_0 : i32, i32
  }
  func.func @transform_4(%arg0: i32, %arg1: i32) -> (i32, i32) {
    %c0_i32 = arith.constant 0 : i32
    %c0_i32_0 = arith.constant 0 : i32
    %c0_i32_1 = arith.constant 0 : i32
    return %c0_i32, %c0_i32_0 : i32, i32
  }
  func.func @transform_5(%arg0: i32, %arg1: i32) -> (i32, i32) {
    %c0_i32 = arith.constant 0 : i32
    %c0_i32_0 = arith.constant 0 : i32
    %c0_i32_1 = arith.constant 0 : i32
    return %c0_i32, %c0_i32_0 : i32, i32
  }
  func.func @transform_6(%arg0: i32, %arg1: i32) -> (i32, i32) {
    %c0_i32 = arith.constant 0 : i32
    %c0_i32_0 = arith.constant 0 : i32
    %c0_i32_1 = arith.constant 0 : i32
    return %c0_i32, %c0_i32_0 : i32, i32
  }
  func.func @transform_7(%arg0: i32, %arg1: i32) -> (i32, i32, i32) {
    %c0_i32 = arith.constant 0 : i32
    %c0_i32_0 = arith.constant 0 : i32
    return %arg0, %c0_i32, %arg1 : i32, i32, i32
  }
}

</mosaic_0001>

<bundles_post_ra>
// kernel: tpu_custom_call.1
= control target key start
LH: loop header
LB: loop body
LE: loop exit
PB: predicated region body
PF: predicated region fallthrough
CT: control target
= control target key end

     0   :  { %12 = vsyncpa [#allocation3], 0  ;;  %s5198_s0 = inlined_call_operand.vmem [shape: f32[2,4,20,20], index: 0, kind: input, shape index: {}]   ;;  %s5199_s1 = inlined_call_operand.vmem [shape: bf16[2,36], index: 1, kind: input, shape index: {}]   ;;  %s5200_s2 = inlined_call_operand.vmem [shape: f32[2,1], index: 2, kind: input, shape index: {}]   ;;  %s5201_s3 = inlined_call_operand.vmem [shape: f32[2,1], index: 3, kind: input, shape index: {}]   ;;  %s5202_s4 = inlined_call_operand.vmem [shape: bf16[4,18], index: 4, kind: input, shape index: {}]   ;;  %s5203_s5 = inlined_call_operand.vmem [shape: f32[4,1], index: 5, kind: input, shape index: {}]   ;;  %s5204_s6 = inlined_call_operand.vmem [shape: f32[4,1], index: 6, kind: input, shape index: {}]   ;;  %s5205_s7 = inlined_call_operand.hbm [shape: f32[2,4,256], index: 7, kind: output, shape index: {}]  }
   0x1   :  { %14 = vsyncpa [#allocation3 + $0x1], 0  ;;  %s3687_s24 = smov 0   ;;  %s3689_s25 = smov 0  }
   0x2   :  { %s3691_s26 = smov 0   ;;  %s3693_s27 = smov 0  }
   0x3   :  { %s3695_s28 = smov 0   ;;  %s3697_s29 = smov 0  }
   0x4   :  { %s3699_s30 = smov 0   ;;  %s3701_s8 = smov 0  }
   0x5 LB: > { %s3348_s9 = sadd.s32 4294967295, %s3615_s8   ;;  %s3349_s10 = sadd.s32 4294967294, %s3615_s8   ;;  %s3615_s8 = sphi %s3701_s8, %s20_s8   ;;  %s3611_s30 = sphi %s3699_s30, %s5279_s30   ;;  %s3607_s29 = sphi %s3697_s29, %s5278_s29   ;;  %s3603_s28 = sphi %s3695_s28, %s5277_s28   ;;  %s3599_s27 = sphi %s3693_s27, %s5276_s27   ;;  %s3595_s26 = sphi %s3691_s26, %s5275_s26   ;;  %s3591_s25 = sphi %s3689_s25, %s5274_s25   ;;  %s3587_s24 = sphi %s3687_s24, %s5273_s24  }
   0x6   : > { %s29_s11 = sadd.s32 1, %s3607_s29  ;;  %s32_s12 = sadd.s32 1, %s3611_s30 }
   0x7   : > { %p30_p0 = scmp.ge.s32.totalorder %s29_s11, 2  ;;  %p203_p1 = scmp.ne.s32.totalorder %s3595_s26, %s3591_s25 }
   0x8   : > { %p204_p2 = scmp.eq.s32.totalorder %s3348_s9, 3  ;;  %p209_p5 = scmp.ne.s32.totalorder %s3591_s25, %s3587_s24 }
   0x9   : > { %s5281_s11 = smov (%p30_p0, %s29_s11), 0  ;;  %s5283_s12 = smov (!%p30_p0, %s32_s12), %s3611_s30 }
   0xa   : > { %s189_s13 = ssub.s32 %s3607_s29, %s5281_s11  ;;  %p3738_p3 = por %p204_p2, %p203_p1 }
   0xb   : > { %p34_p4 = scmp.ge.s32.totalorder %s5283_s12, 2  ;;  %p210_p6 = scmp.eq.s32.totalorder %s3349_s10, 3 }
   0xc   : > { %p3352_p7 = scmp.ge.s32.totalorder %s3615_s8, 1  ;;  %p254_p9 = scmp.lt.s32.totalorder %s3615_s8, 5 }
   0xd   : > { %s5285_s12 = smov (%p34_p4, %s5283_s12), 0  ;;  %p3747_p8 = por %p210_p6, %p209_p5 }
   0xe   : > { %s188_s16 = ssub.s32 %s3611_s30, %s5285_s12  ;;  %s193_s17 = sadd.s32 1, %s3595_s26 }
   0xf   : > { %s190_s18 = sor.u32 %s189_s13, %s188_s16  ;;  %p255_p10 = pnand %p3352_p7, %p254_p9 }
  0x10   : > { %p191_p11 = scmp.eq.s32.totalorder %s190_s18, 0 }
  0x11   : > { %258 = sbr.rel (%p255_p10) target bundleno = 1383 (0x567), region = 48 }
  0x12   : > { %s3756_s19 = scalar_select %p191_p11, %s3595_s26, %s193_s17  }
  0x18   : > { %p286_p12 = scmp.lt.s32.totalorder %s3603_s28, 1  ;;  %v5210_v0 = vmov 0   ;;  %s5208_s22 = sshll.u32 %s3599_s27, 3  ;;  %v3620_v28 = vmov 1983009808   ;;  %v5209_v30 = vlaneseq  ;;  %vm438_vm0 = vcmask 146432  }
  0x19   : > { %1885 = vmatprep.mubr.bf16.mxu0 %v5210_v0  ;;  %3499 = vset.pattern.permute.xlu1 %v5210_v0  ;;  %s5206_s16 = smov 127   ;;  %s3619_s17 = smov 126   ;;  %v307_v29 = vunpack.c.l.s4 %v3620_v28  ;;  %v3621_v34 = vmov 1934713408   ;;  %vm442_vm1 = vcmask 293888   ;;  %vm445_vm2 = vcmask 441344  }
  0x1a   : > { %s287_s20 = scalar_select %p286_p12, %s3603_s28, 1  ;;  %3500 = vset.pattern.permute.xlu0 %v5210_v0  ;;  %v3820_v33 = vshrl.u32 %v5209_v30, 7  ;;  %v325_v35 = vunpack.c.l.s4 %v3621_v34  ;;  %vm448_vm3 = vcmask 588800   ;;  %vm451_vm4 = vcmask 736256  }
  0x1b   : > { %v308_v32 = vunpack.c.0.s8 %v307_v29  ;;  %s3622_s18 = smov 18   ;;  %s3625_s23 = smov 90   ;;  %vm454_vm5 = vcmask 883712   ;;  %vm460_vm6 = vcmask 130048   ;;  %vm457_vm7 = vcmask 1031168  }
  0x1c   : > { %s3398_s21 = smul.u32 96, %s287_s20  ;;  %5232 = vst [vmem:[#allocation5_spill] sm:$0xff] %v3820_v33  ;;  %v326_v39 = vunpack.c.0.s8 %v325_v35  ;;  %s3623_s20 = smov 36   ;;  %vm463_vm8 = vcmask 277504   ;;  %vm1814_vm9 = vcmask 1041408   ;;  %vm1819_vm10 = vcmask 1043456  }
  0x1d   : > { %v3827_v36 = vsub.s32 %v308_v32, %v3820_v33  ;;  %s3626_s9 = smov 72   ;;  %vm1824_vm11 = vcmask 1045504   ;;  %vm1948_vm12 = vcmask 15360  }
  0x1e   : > { %s290_s10 = scalar_lea.vmem %s5198_s0, %s3398_s21  ;;  %v3857_v50 = vsub.s32 %v326_v39, %v3820_v33  ;;  %s3624_s21 = smov 54  }
  0x1f   : > { %s3769_s13 = scalar_lea.vmem %s290_s10, %s5208_s22  ;;  %5233 = vst [vmem:[#allocation6_spill] sm:$0xff] %v3827_v36  ;;  %s5225_s10 = smov 16  }
  0x20   : > { %v298_v1 = vld [vmem:[%s3769_s13 + $0x30] sm:$0xff]  ;;  %v3773_v2 = vld [vmem:[%s3769_s13 + $0x38] sm:$0xf]  ;;  %v294_v3 = vld [vmem:[%s3769_s13] sm:$0xff]  ;;  %s3629_s22 = smov 34  }
  0x21   : > { %v3777_v4 = vpack.c.bf16 %v3773_v2, %v298_v1  ;;  %v3780_v5 = vld [vmem:[%s3769_s13 + $0x8] sm:$0xf]  ;;  %v3784_v7 = vld [vmem:[%s3769_s13 + $0x50] sm:$0xf]  ;;  %v296_v9 = vld [vmem:[%s3769_s13 + $0x18] sm:$0xff] }
  0x22   : > { %v300_v6 = vld [vmem:[%s3769_s13 + $0x48] sm:$0xff]  ;;  %v302_v8 = vpack.c.bf16 %v3780_v5, %v294_v3  ;;  %v3789_v10 = vld [vmem:[%s3769_s13 + $0x20] sm:$0xf]  ;;  %v3356_v34 = vpack.c.bf16 %v3773_v2, %v3780_v5 }
  0x23   : > { %474 = vrot.lane.b32.xlu1 %v3777_v4, %s5206_s16  ;;  %v305_v11 = vpack.c.bf16 %v3784_v7, %v300_v6  ;;  %v303_v12 = vpack.c.bf16 %v3789_v10, %v296_v9  ;;  %v813_v20 = vshll.u32 %v3777_v4, 16  ;;  %v811_v25 = vshrl.u32 %v3777_v4, 16 }
  0x24   : > { %470 = vrot.lane.b32.xlu0 %v302_v8, %s5206_s16  ;;  %v799_v14 = vshll.u32 %v302_v8, 16  ;;  %v797_v18 = vshrl.u32 %v302_v8, 16  ;;  %v3833_v38 = vrot.slane %v302_v8, 1  ;;  %v312_v40 = vrot.slane %v302_v8, %v3827_v36 }
  0x25   : > { %v806_v13 = vshll.u32 %v303_v12, 16  ;;  %v804_v15 = vshrl.u32 %v303_v12, 16  ;;  %v820_v17 = vshll.u32 %v305_v11, 16  ;;  %v818_v22 = vshrl.u32 %v305_v11, 16 }
  0x26   : > { %v801_v19 = vrot.slane %v799_v14, 1  ;;  %v815_v26 = vrot.slane %v813_v20, 1  ;;  %v3831_v37 = vrot.slane %v303_v12, 1  ;;  %v320_v41 = vrot.slane %v3777_v4, %v3827_v36 }
  0x27   : > { %476 = vrot.lane.b32.xlu1 %v305_v11, %s5206_s16  ;;  %v808_v16 = vrot.slane %v806_v13, 1  ;;  %v822_v23 = vrot.slane %v820_v17, 1  ;;  %v354_v42 = vrot.slane %v303_v12, %v3827_v36  ;;  %v362_v43 = vrot.slane %v305_v11, %v3827_v36 }
  0x28   : > { %472 = vrot.lane.b32.xlu0 %v303_v12, %s5206_s16  ;;  %v3806_v24 = vor.u32 %v801_v19, %v797_v18  ;;  %v3815_v31 = vor.u32 %v815_v26, %v811_v25  ;;  %v3854_v48 = vrot.slane %v305_v11, 1  ;;  %v322_v49 = vcombine.low %v312_v40, %v320_v41 }
  0x29   : > { %v3802_v21 = vor.u32 %v808_v16, %v804_v15  ;;  %v3811_v27 = vor.u32 %v822_v23, %v818_v22  ;;  %v364_v51 = vcombine.low %v354_v42, %v362_v43  ;;  %v3862_v52 = vrot.slane %v3777_v4, 1 }
  0x2a   : > { %v834_v44 = vrot.slane %v3806_v24, %v3827_v36  ;;  %v842_v45 = vrot.slane %v3815_v31, %v3827_v36  ;;  %v3867_v55 = vrot.slane %v322_v49, %v3857_v50  ;;  %v323_v63 = vcombine.high %v312_v40, %v320_v41 }
  0x2b   : > { %635 = vrot.lane.b32.xlu1 %v303_v12, %s3619_s17  ;;  %v876_v46 = vrot.slane %v3802_v21, %v3827_v36  ;;  %v884_v47 = vrot.slane %v3811_v27, %v3827_v36  ;;  %v3870_v56 = vrot.slane %v364_v51, %v3857_v50  ;;  %v365_v1 = vcombine.high %v354_v42, %v362_v43 }
  0x2c   : > { %633 = vrot.lane.b32.xlu0 %v302_v8, %s3619_s17  ;;  %v844_v53 = vcombine.low %v834_v44, %v842_v45  ;;  %5234 = vst [vmem:[#allocation7_spill] sm:$0xff] %v3867_v55  ;;  %v393_v59 = vshrl.u32 %v3867_v55, 16  ;;  %v339_v3 = vcombine.high %v3867_v55, %v5210_v0  ;;  %v337_v12 = vrot.slane %v323_v63, %v3857_v50 }
  0x2d   : > { %v886_v54 = vcombine.low %v876_v46, %v884_v47  ;;  %5235 = vst [vmem:[#allocation8_spill] sm:$0xff] %v3870_v56  ;;  %v394_v60 = vshrl.u32 %v3870_v56, 16  ;;  %v379_v13 = vrot.slane %v365_v1, %v3857_v50  ;;  %v845_v16 = vcombine.high %v834_v44, %v842_v45 }
  0x2e   : > { %v3875_v57 = vrot.slane %v844_v53, %v3857_v50  ;;  %v399_v15 = vshrl.u32 %v339_v3, 16  ;;  %v887_v17 = vcombine.high %v876_v46, %v884_v47  ;;  %v1319_v23 = vrot.slane %v3833_v38, %v3827_v36 }
  0x2f   : > { %639 = vrot.lane.b32.xlu1 %v305_v11, %s3619_s17  ;;  %v3878_v58 = vrot.slane %v886_v54, %v3857_v50  ;;  %v395_v6 = vpack.i.b16 %v394_v60, %v393_v59  ;;  %v1327_v25 = vrot.slane %v3862_v52, %v3827_v36  ;;  %v1361_v26 = vrot.slane %v3831_v37, %v3827_v36 }
  0x30   : > { %637 = vrot.lane.b32.xlu0 %v3777_v4, %s3619_s17  ;;  %5236 = vst [vmem:[#allocation9_spill] sm:$0xff] %v3875_v57  ;;  %v915_v61 = vshrl.u32 %v3875_v57, 16  ;;  %v381_v4 = vcombine.high %v3870_v56, %v5210_v0  ;;  %v861_v8 = vcombine.high %v3875_v57, %v5210_v0  ;;  %v1369_v28 = vrot.slane %v3854_v48, %v3827_v36 }
  0x31   : > { %5237 = vst [vmem:[#allocation10_spill] sm:$0xff] %v3878_v58  ;;  %v916_v62 = vshrl.u32 %v3878_v58, 16  ;;  %v903_v9 = vcombine.high %v3878_v58, %v5210_v0  ;;  %v3919_v35 = vrot.slane %v845_v16, %v3857_v50  ;;  %v3922_v39 = vrot.slane %v887_v17, %v3857_v50 }
  0x32   : > { %v398_v14 = vpack.i.b16 %v381_v4, %v339_v3  ;;  %v400_v19 = vshrl.u32 %v381_v4, 16  ;;  %v921_v20 = vshrl.u32 %v861_v8, 16  ;;  %v405_v41 = vshrl.u32 %v337_v12, 16 }
  0x33   : > { %1144 = vrot.lane.b32.xlu1 %v3802_v21, %s3619_s17  ;;  %v917_v11 = vpack.i.b16 %v916_v62, %v915_v61  ;;  %v920_v18 = vpack.i.b16 %v903_v9, %v861_v8  ;;  %v922_v22 = vshrl.u32 %v903_v9, 16  ;;  %v406_v42 = vshrl.u32 %v379_v13, 16 }
  0x34   : > { %1142 = vrot.lane.b32.xlu0 %v3806_v24, %s3619_s17  ;;  %v401_v40 = vpack.i.b16 %v400_v19, %v399_v15  ;;  %v3357_v43 = vpack.c.bf16 %v3784_v7, %v3789_v10  ;;  %v1329_v45 = vcombine.low %v1319_v23, %v1327_v25  ;;  %v1371_v2 = vcombine.low %v1361_v26, %v1369_v28 }
  0x35   : > { %v923_v44 = vpack.i.b16 %v922_v22, %v921_v20  ;;  %v3930_v5 = vcombine.high %v3919_v35, %v5210_v0  ;;  %v3934_v46 = vcombine.high %v3922_v39, %v5210_v0  ;;  %v407_v47 = vpack.i.b16 %v406_v42, %v405_v41 }
  0x36   : > { %v3938_v49 = vrot.slane %v3356_v34, %v3857_v50  ;;  %v3941_v7 = vrot.slane %v3357_v43, %v3857_v50  ;;  %v404_v10 = vpack.i.b16 %v379_v13, %v337_v12  ;;  %v3945_v51 = vrot.slane %v1329_v45, %v3857_v50 }
  0x37   : > { %1148 = vrot.lane.b32.xlu1 %v3811_v27, %s3619_s17  ;;  %v3948_v53 = vrot.slane %v1371_v2, %v3857_v50  ;;  %v933_v54 = vshrl.u32 %v3930_v5, 16  ;;  %v934_v59 = vshrl.u32 %v3934_v46, 16  ;;  %v340_v61 = vcombine.high %v337_v12, %v5210_v0 }
  0x38   : > { %1146 = vrot.lane.b32.xlu0 %v3815_v31, %s3619_s17  ;;  %5238 = vst [vmem:[#allocation11_spill] sm:$0xff] %v3945_v51  ;;  %v416_v60 = vpack.i.b16 %v3941_v7, %v3938_v49  ;;  %v926_v62 = vpack.i.b16 %v3922_v39, %v3919_v35  ;;  %v1400_v63 = vshrl.u32 %v3945_v51, 16  ;;  %v382_v3 = vcombine.high %v379_v13, %v5210_v0 }
  0x39   : > { %5239 = vst [vmem:[#allocation12_spill] sm:$0xff] %v3948_v53  ;;  %v1401_v1 = vshrl.u32 %v3948_v53, 16  ;;  %v1330_v4 = vcombine.high %v1319_v23, %v1327_v25  ;;  %v935_v8 = vpack.i.b16 %v934_v59, %v933_v54  ;;  %v1346_v9 = vcombine.high %v3945_v51, %v5210_v0 }
  0x3a   : > { %v411_v15 = vshrl.u32 %v340_v61, 16  ;;  %v412_v16 = vshrl.u32 %v382_v3, 16  ;;  %v3368_v20 = vcombine.high %v3833_v38, %v3862_v52  ;;  %v927_v22 = vshrl.u32 %v3919_v35, 16 }
  0x3b   : > { %981 = vrot.lane.b32.xlu1 %v3802_v21, %s5206_s16  ;;  %v3968_v12 = vrot.slane %v1330_v4, %v3857_v50  ;;  %v1402_v13 = vpack.i.b16 %v1401_v1, %v1400_v63  ;;  %v3369_v23 = vcombine.high %v3831_v37, %v3854_v48  ;;  %v418_v45 = vshrl.u32 %v3941_v7, 16 }
  0x3c   : > { %979 = vrot.lane.b32.xlu0 %v3806_v24, %s5206_s16  ;;  %v3988_v34 = vrot.slane %v3368_v20, %v3857_v50 }
  0x3d   : > { %v1412_v17 = vshrl.u32 %v3968_v12, 16  ;;  %v4014_v2 = vcombine.high %v3968_v12, %v5210_v0 }
  0x3f   : > { %985 = vrot.lane.b32.xlu1 %v3811_v27, %s5206_s16  ;;  %v1418_v54 = vshrl.u32 %v4014_v2, 16 }
  0x40   : > { %983 = vrot.lane.b32.xlu0 %v3815_v31, %s5206_s16 }
  0x43   : > { %1466 = vrot.lane.b32.xlu1 %v3831_v37, %s5206_s16 }
  0x44   : > { %1464 = vrot.lane.b32.xlu0 %v3833_v38, %s5206_s16 }
  0x47   : > { %1470 = vrot.lane.b32.xlu1 %v3854_v48, %s5206_s16 }
  0x48   : > { %1468 = vrot.lane.b32.xlu0 %v3862_v52, %s5206_s16  ;;  %s3628_s16 = smov 108  }
  0x4b   : > { %1629 = vrot.lane.b32.xlu1 %v3831_v37, %s3619_s17  ;;  %v3996_v37 = vrot.slane %v3369_v23, %v3857_v50 }
  0x4c   : > { %1627 = vrot.lane.b32.xlu0 %v3833_v38, %s3619_s17  ;;  %v3362_v38 = vcombine.high %v3806_v24, %v3815_v31 }
  0x4e   : > { %v869_v24 = vrot.slane %v3362_v38, %v3857_v50 }
  0x4f   : > { %1633 = vrot.lane.b32.xlu1 %v3854_v48, %s3619_s17 }
  0x50   : > { %1631 = vrot.lane.b32.xlu0 %v3862_v52, %s3619_s17  ;;  %v3363_v52 = vcombine.high %v3802_v21, %v3811_v27  ;;  %v932_v21 = vpack.i.b16 %v3934_v46, %v3930_v5  ;;  %v1406_v27 = vshrl.u32 %v1346_v9, 16  ;;  %v1425_v5 = vshrl.u32 %v3996_v37, 16 }
  0x51   : > { %v939_v59 = vshrl.u32 %v869_v24, 16 }
  0x52   : > { %v911_v31 = vrot.slane %v3363_v52, %v3857_v50 }
  0x53   : > { %420 = vrot.lane.b32.xlu1 %v395_v6, %s3622_s18  ;;  %v1372_v6 = vcombine.high %v1361_v26, %v1369_v28  ;;  %v928_v26 = vshrl.u32 %v3922_v39, 16  ;;  %v410_v39 = vpack.i.b16 %v382_v3, %v340_v61 }
  0x54   : > { %942 = vrot.lane.b32.xlu0 %v917_v11, %s3622_s18  ;;  %v1388_v11 = vcombine.high %v3948_v53, %v5210_v0  ;;  %v938_v43 = vpack.i.b16 %v911_v31, %v869_v24 }
  0x55   : > { %v929_v41 = vpack.i.b16 %v928_v26, %v927_v22 }
  0x56   : > { %v1405_v25 = vpack.i.b16 %v1388_v11, %v1346_v9  ;;  %v1407_v42 = vshrl.u32 %v1388_v11, 16 }
  0x57   : > { %422 = vrot.lane.b32.xlu1 %v398_v14, %s3623_s20  ;;  %v3971_v14 = vrot.slane %v1372_v6, %v3857_v50 }
  0x58   : > { %944 = vrot.lane.b32.xlu0 %v920_v18, %s3623_s20  ;;  %v1408_v46 = vpack.i.b16 %v1407_v42, %v1406_v27 }
  0x59   : > { %v1413_v18 = vshrl.u32 %v3971_v14, 16 }
  0x5b   : > { %424 = vrot.lane.b32.xlu1 %v401_v40, %s3624_s21  ;;  %v3985_v28 = vpack.i.b16 %v1413_v18, %v1412_v17  ;;  %v413_v40 = vpack.i.b16 %v412_v16, %v411_v15 }
  0x5c   : > { %946 = vrot.lane.b32.xlu0 %v923_v44, %s3624_s21  ;;  %v417_v44 = vshrl.u32 %v3938_v49, 16 }
  0x5e   : > { %v419_v7 = vpack.i.b16 %v418_v45, %v417_v44 }
  0x5f   : > { %428 = vrot.lane.b32.xlu1 %v407_v47, %s3625_s23  ;;  %v4018_v47 = vcombine.high %v3971_v14, %v5210_v0 }
  0x60   : > { %426 = vrot.lane.b32.xlu0 %v404_v10, %s3626_s9  ;;  %v1424_v10 = vshrl.u32 %v3988_v34, 16 }
  0x61   : > { %v1419_v49 = vshrl.u32 %v4018_v47, 16 }
  0x62   : > { %v4026_v61 = vpack.i.b16 %v1425_v5, %v1424_v10 }
  0x63   : > { %434 = vrot.lane.b32.xlu1 %v416_v60, %s5225_s10  ;;  %v940_v60 = vshrl.u32 %v911_v31, 16 }
  0x64   : > { %948 = vrot.lane.b32.xlu0 %v926_v62, %s3626_s9  ;;  %v4028_v62 = vpack.i.b16 %v1419_v49, %v1418_v54 }
  0x65   : > { %v941_v63 = vpack.i.b16 %v940_v60, %v939_v59 }
  0x67   : > { %954 = vrot.lane.b32.xlu1 %v935_v8, %s3619_s17 }
  0x68   : > { %1427 = vrot.lane.b32.xlu0 %v1402_v13, %s3622_s18 }
  0x6b   : > { %1429 = vrot.lane.b32.xlu1 %v1405_v25, %s3623_s20 }
  0x6c   : > { %432 = vrot.lane.b32.xlu0 %v413_v40, %s3619_s17 }
  0x6f   : > { %430 = vrot.lane.b32.xlu1 %v410_v39, %s3628_s16 }
  0x70   : > { %950 = vrot.lane.b32.xlu0 %v929_v41, %s3625_s23 }
  0x73   : > { %952 = vrot.lane.b32.xlu1 %v932_v21, %s3628_s16 }
  0x74   : > { %956 = vrot.lane.b32.xlu0 %v938_v43, %s5225_s10 }
  0x77   : > { %1431 = vrot.lane.b32.xlu1 %v1408_v46, %s3624_s21 }
  0x78   : > { %436 = vrot.lane.b32.xlu0 %v419_v7, %s3629_s22 }
  0x7c   : > { %958 = vrot.lane.b32.xlu0 %v941_v63, %s3629_s22 }
  0x95   : > { %v475_v3 = vpop.permute.xlu1 %474 }
  0x96   : > { %v471_v4 = vpop.permute.xlu0 %470  ;;  %v496_v6 = vrot.slane %v475_v3, %v3827_v36 }
  0x97   : > { %v488_v8 = vrot.slane %v471_v4, %v3827_v36  ;;  %v3358_v9 = vcombine.high %v471_v4, %v475_v3 }
  0x99   : > { %v477_v11 = vpop.permute.xlu1 %476  ;;  %v498_v18 = vcombine.low %v488_v8, %v496_v6  ;;  %v499_v20 = vcombine.high %v488_v8, %v496_v6  ;;  %v523_v22 = vrot.slane %v3358_v9, %v3857_v50 }
  0x9a   : > { %v538_v13 = vrot.slane %v477_v11, %v3827_v36  ;;  %v473_v15 = vpop.permute.xlu0 %472 }
  0x9b   : > { %v530_v16 = vrot.slane %v473_v15, %v3827_v36  ;;  %v3359_v17 = vcombine.high %v473_v15, %v477_v11  ;;  %v4045_v41 = vrot.slane %v498_v18, %v3857_v50  ;;  %v4048_v24 = vrot.slane %v499_v20, %v3857_v50 }
  0x9c   : > { %v593_v60 = vshrl.u32 %v523_v22, 16 }
  0x9d   : > { %v541_v23 = vcombine.high %v530_v16, %v538_v13  ;;  %v565_v25 = vrot.slane %v3359_v17, %v3857_v50  ;;  %v636_v26 = vpop.permute.xlu1 %635  ;;  %v540_v40 = vcombine.low %v530_v16, %v538_v13  ;;  %v569_v20 = vshrl.u32 %v4045_v41, 16 }
  0x9e   : > { %v634_v38 = vpop.permute.xlu0 %633  ;;  %v693_v31 = vrot.slane %v636_v26, %v3827_v36 }
  0x9f   : > { %v4042_v52 = vrot.slane %v541_v23, %v3857_v50  ;;  %v592_v39 = vpack.i.b16 %v565_v25, %v523_v22  ;;  %v4053_v27 = vrot.slane %v540_v40, %v3857_v50  ;;  %v594_v45 = vshrl.u32 %v565_v25, 16 }
  0xa0   : > { %v651_v10 = vrot.slane %v634_v38, %v3827_v36 }
  0xa1   : > { %610 = vrot.lane.b32.xlu0 %v592_v39, %s5225_s10  ;;  %v640_v21 = vpop.permute.xlu1 %639  ;;  %v580_v54 = vpack.i.b16 %v4042_v52, %v4048_v24  ;;  %v595_v11 = vpack.i.b16 %v594_v45, %v593_v60  ;;  %v570_v13 = vshrl.u32 %v4053_v27, 16 }
  0xa2   : > { %v701_v42 = vrot.slane %v640_v21, %v3827_v36  ;;  %v3361_v43 = vcombine.high %v636_v26, %v640_v21  ;;  %v638_v44 = vpop.permute.xlu0 %637 }
  0xa3   : > { %v659_v5 = vrot.slane %v638_v44, %v3827_v36  ;;  %v3360_v46 = vcombine.high %v634_v38, %v638_v44  ;;  %v571_v25 = vpack.i.b16 %v570_v13, %v569_v20  ;;  %v557_v44 = vcombine.high %v4053_v27, %v5210_v0 }
  0xa4   : > { %v703_v49 = vcombine.low %v693_v31, %v701_v42  ;;  %v704_v7 = vcombine.high %v693_v31, %v701_v42  ;;  %v728_v59 = vrot.slane %v3361_v43, %v3857_v50  ;;  %v582_v43 = vshrl.u32 %v4042_v52, 16 }
  0xa5   : > { %v661_v63 = vcombine.low %v651_v10, %v659_v5  ;;  %v662_v3 = vcombine.high %v651_v10, %v659_v5  ;;  %v686_v4 = vrot.slane %v3360_v46, %v3857_v50  ;;  %602 = vrot.lane.b32.xlu0 %v580_v54, %s3626_s9  ;;  %v4063_v6 = vpop.permute.xlu1 %1144  ;;  %v581_v5 = vshrl.u32 %v4048_v24, 16 }
  0xa6   : > { %v4066_v8 = vrot.slane %v703_v49, %v3857_v50  ;;  %v4068_v9 = vpop.permute.xlu0 %1142  ;;  %v4072_v15 = vrot.slane %v704_v7, %v3857_v50  ;;  %v757_v26 = vshrl.u32 %v728_v59, 16  ;;  %v515_v46 = vcombine.high %v4045_v41, %v5210_v0 }
  0xa7   : > { %v4075_v16 = vrot.slane %v661_v63, %v3857_v50  ;;  %v4078_v17 = vrot.slane %v662_v3, %v3857_v50  ;;  %v755_v18 = vpack.i.b16 %v728_v59, %v686_v4  ;;  %v756_v31 = vshrl.u32 %v686_v4, 16 }
  0xa8   : > { %v733_v39 = vshrl.u32 %v4066_v8, 16  ;;  %v583_v7 = vpack.i.b16 %v582_v43, %v581_v5  ;;  %v574_v59 = vpack.i.b16 %v557_v44, %v515_v46  ;;  %v721_v63 = vcombine.high %v4072_v15, %v5210_v0 }
  0xa9   : > { %612 = vrot.lane.b32.xlu0 %v595_v11, %s3629_s22  ;;  %773 = vrot.lane.b32.xlu1 %v755_v18, %s5225_s10  ;;  %v4083_v22 = vpop.permute.xlu1 %1148  ;;  %v743_v40 = vpack.i.b16 %v4072_v15, %v4078_v17  ;;  %v732_v38 = vshrl.u32 %v4075_v16, 16  ;;  %v758_v10 = vpack.i.b16 %v757_v26, %v756_v31  ;;  %v679_v60 = vcombine.high %v4078_v17, %v5210_v0 }
  0xaa   : > { %v4085_v23 = vpop.permute.xlu0 %1146  ;;  %v678_v3 = vcombine.high %v4075_v16, %v5210_v0  ;;  %v720_v4 = vcombine.high %v4066_v8, %v5210_v0  ;;  %v576_v13 = vshrl.u32 %v557_v44, 16  ;;  %v4125_v20 = vcombine.high %v4042_v52, %v5210_v0 }
  0xab   : > { %v734_v45 = vpack.i.b16 %v733_v39, %v732_v38  ;;  %v1202_v38 = vrot.slane %v4063_v6, %v3827_v36  ;;  %v1160_v39 = vrot.slane %v4068_v9, %v3827_v36  ;;  %v516_v43 = vcombine.high %v4048_v24, %v5210_v0 }
  0xac   : > { %v737_v26 = vpack.i.b16 %v720_v4, %v678_v3  ;;  %v1210_v52 = vrot.slane %v4083_v22, %v3827_v36  ;;  %v1168_v5 = vrot.slane %v4085_v23, %v3827_v36  ;;  %v744_v30 = vshrl.u32 %v4078_v17, 16 }
  0xad   : > { %596 = vrot.lane.b32.xlu0 %v571_v25, %s3622_s18  ;;  %765 = vrot.lane.b32.xlu1 %v743_v40, %s3626_s9  ;;  %v4093_v21 = vpop.permute.xlu1 %981  ;;  %v749_v25 = vpack.i.b16 %v721_v63, %v679_v60  ;;  %v575_v40 = vshrl.u32 %v515_v46, 16  ;;  %v739_v35 = vshrl.u32 %v720_v4, 16 }
  0xae   : > { %v4095_v42 = vpop.permute.xlu0 %979  ;;  %v1212_v48 = vcombine.low %v1202_v38, %v1210_v52  ;;  %v1213_v19 = vcombine.high %v1202_v38, %v1210_v52  ;;  %v1171_v0 = vcombine.high %v1160_v39, %v1168_v5 }
  0xb0   : > { %v4176_v51 = vrot.slane %v1212_v48, %v3857_v50  ;;  %v4194_v48 = vrot.slane %v4093_v21, %v3827_v36 }
  0xb1   : > { %759 = vrot.lane.b32.xlu0 %v734_v45, %s3622_s18  ;;  %775 = vrot.lane.b32.xlu1 %v758_v10, %s3629_s22  ;;  %v4105_v54 = vpop.permute.xlu1 %985  ;;  %v577_v10 = vpack.i.b16 %v576_v13, %v575_v40  ;;  %v745_v13 = vshrl.u32 %v4072_v15, 16 }
  0xb2   : > { %v4107_v49 = vpop.permute.xlu0 %983  ;;  %v4202_v38 = vrot.slane %v4105_v54, %v3827_v36 }
  0xb3   : > { %v746_v1 = vpack.i.b16 %v745_v13, %v744_v30  ;;  %v1227_v13 = vrot.slane %v1213_v19, %v3857_v50 }
  0xb5   : > { %604 = vrot.lane.b32.xlu0 %v583_v7, %s3625_s23  ;;  %598 = vrot.lane.b32.xlu1 %v574_v59, %s3623_s20  ;;  %v4119_v11 = vpop.permute.xlu1 %1466  ;;  %v586_v7 = vpack.i.b16 %v4125_v20, %v516_v43  ;;  %v750_v59 = vshrl.u32 %v679_v60, 16  ;;  %v1170_v60 = vcombine.low %v1160_v39, %v1168_v5  ;;  %v4206_v39 = vrot.slane %v4107_v49, %v3827_v36 }
  0xb6   : > { %v4121_v18 = vpop.permute.xlu0 %1464  ;;  %v4133_v31 = vrot.slane %v4119_v11, %v3827_v36 }
  0xb7   : > { %v4141_v44 = vrot.slane %v4121_v18, %v3827_v36  ;;  %v4190_v4 = vrot.slane %v1170_v60, %v3857_v50  ;;  %v1049_v60 = vcombine.low %v4194_v48, %v4202_v38 }
  0xb9   : > { %769 = vrot.lane.b32.xlu0 %v749_v25, %s3628_s16  ;;  %761 = vrot.lane.b32.xlu1 %v737_v26, %s3623_s20  ;;  %v4145_v45 = vpop.permute.xlu1 %1470  ;;  %v751_v26 = vshrl.u32 %v721_v63, 16  ;;  %v738_v63 = vshrl.u32 %v678_v3, 16  ;;  %v5240_v3 = vmov 0  }
  0xba   : > { %v4151_v24 = vrot.slane %v4145_v45, %v3827_v36  ;;  %v4153_v46 = vpop.permute.xlu0 %1468 }
  0xbb   : > { %v4158_v25 = vrot.slane %v4153_v46, %v3827_v36  ;;  %v752_v15 = vpack.i.b16 %v751_v26, %v750_v59  ;;  %v740_v5 = vpack.i.b16 %v739_v35, %v738_v63  ;;  %v587_v26 = vshrl.u32 %v516_v43, 16 }
  0xbc   : > { %v1534_v40 = vcombine.low %v4133_v31, %v4151_v24  ;;  %v1241_v63 = vshrl.u32 %v4190_v4, 16 }
  0xbd   : > { %v1492_v29 = vcombine.low %v4141_v44, %v4158_v25  ;;  %600 = vrot.lane.b32.xlu0 %v577_v10, %s3624_s21  ;;  %606 = vrot.lane.b32.xlu1 %v586_v7, %s3628_s16  ;;  %v588_v7 = vshrl.u32 %v4125_v20, 16 }
  0xbe   : > { %v4169_v32 = vrot.slane %v1534_v40, %v3857_v50  ;;  %v1185_v40 = vrot.slane %v1171_v0, %v3857_v50  ;;  %v4228_v0 = vrot.slane %v1049_v60, %v3857_v50  ;;  %v3366_v60 = vcombine.high %v4068_v9, %v4085_v23 }
  0xbf   : > { %v4172_v17 = vrot.slane %v1492_v29, %v3857_v50  ;;  %v589_v20 = vpack.i.b16 %v588_v7, %v587_v26  ;;  %v1187_v7 = vcombine.high %v4190_v4, %v5240_v3  ;;  %v1229_v26 = vcombine.high %v4176_v51, %v5240_v3 }
  0xc0   : > { %v1564_v33 = vshrl.u32 %v4169_v32, 16  ;;  %v4187_v30 = vcombine.high %v4169_v32, %v5240_v3  ;;  %v1252_v19 = vpack.i.b16 %v1227_v13, %v1185_v40  ;;  %v1253_v43 = vshrl.u32 %v1185_v40, 16 }
  0xc1   : > { %771 = vrot.lane.b32.xlu0 %v752_v15, %s3619_s17  ;;  %767 = vrot.lane.b32.xlu1 %v746_v1, %s3625_s23  ;;  %v1563_v10 = vshrl.u32 %v4172_v17, 16  ;;  %v4183_v29 = vcombine.high %v4172_v17, %v5240_v3  ;;  %v4198_v1 = vrot.slane %v4095_v42, %v3827_v36  ;;  %v4217_v15 = vpop.permute.xlu1 %1629  ;;  %v1079_v23 = vshrl.u32 %v4228_v0, 16 }
  0xc2   : > { %5241 = vst [vmem:[#allocation13_spill] sm:$0xff] %v4217_v15  ;;  %v1247_v56 = vshrl.u32 %v1187_v7, 16  ;;  %v4269_v58 = vrot.slane %v3366_v60, %v3857_v50  ;;  %v1188_v60 = vcombine.high %v1185_v40, %v5240_v3 }
  0xc3   : > { %v1565_v52 = vpack.i.b16 %v1564_v33, %v1563_v10  ;;  %v1568_v59 = vpack.i.b16 %v4187_v30, %v4183_v29  ;;  %v4219_v33 = vpop.permute.xlu0 %1627  ;;  %v1007_v35 = vcombine.low %v4198_v1, %v4206_v39  ;;  %v1242_v10 = vshrl.u32 %v4176_v51, 16 }
  0xc4   : > { %5242 = vst [vmem:[#allocation14_spill] sm:$0xff] %v4219_v33 }
  0xc5   : > { %1590 = vrot.lane.b32.xlu0 %v1565_v52, %s3622_s18  ;;  %763 = vrot.lane.b32.xlu1 %v740_v5, %s3624_s21  ;;  %v1254_v52 = vshrl.u32 %v1227_v13, 16  ;;  %v4231_v5 = vrot.slane %v1007_v35, %v3857_v50  ;;  %v1243_v53 = vpack.i.b16 %v1242_v10, %v1241_v63  ;;  %v4245_v55 = vpop.permute.xlu1 %1633  ;;  %v4253_v63 = vrot.slane %v4219_v33, %v3827_v36 }
  0xc6   : > { %v1246_v10 = vpack.i.b16 %v1229_v26, %v1187_v7 }
  0xc7   : > { %v4247_v35 = vpop.permute.xlu0 %1631  ;;  %v1024_v33 = vcombine.high %v4231_v5, %v5240_v3 }
  0xc8   : > { %5243 = vst [vmem:[#allocation15_spill] sm:$0xff] %v4247_v35  ;;  %v4261_v9 = vrot.slane %v4247_v35, %v3827_v36 }
  0xc9   : > { %1592 = vrot.lane.b32.xlu0 %v1568_v59, %s3623_s20  ;;  %608 = vrot.lane.b32.xlu1 %v589_v20, %s3619_s17  ;;  %v3367_v59 = vcombine.high %v4063_v6, %v4083_v22  ;;  %v4243_v20 = vrot.slane %v4217_v15, %v3827_v36  ;;  %v4257_v6 = vrot.slane %v4245_v55, %v3827_v36 }
  0xca   : > { %v1255_v22 = vpack.i.b16 %v1254_v52, %v1253_v43  ;;  %v1655_v43 = vcombine.low %v4253_v63, %v4261_v9  ;;  %v1066_v52 = vcombine.high %v4228_v0, %v5240_v3 }
  0xcb   : > { %v4266_v57 = vrot.slane %v3367_v59, %v3857_v50  ;;  %v1697_v36 = vcombine.low %v4243_v20, %v4257_v6 }
  0xcc   : > { %v1083_v15 = vpack.i.b16 %v1066_v52, %v1024_v33 }
  0xcd   : > { %1274 = vrot.lane.b32.xlu0 %v1252_v19, %s3626_s9  ;;  %1268 = vrot.lane.b32.xlu1 %v1243_v53, %s3622_s18  ;;  %v1248_v19 = vshrl.u32 %v1229_v26, 16  ;;  %v1078_v53 = vshrl.u32 %v4231_v5, 16  ;;  %v1264_v59 = vpack.i.b16 %v4266_v57, %v4269_v58  ;;  %v4285_v35 = vrot.slane %v1697_v36, %v3857_v50 }
  0xce   : > { %v1259_v36 = vshrl.u32 %v1188_v60, 16 }
  0xcf   : > { %v1249_v7 = vpack.i.b16 %v1248_v19, %v1247_v56  ;;  %v1080_v26 = vpack.i.b16 %v1079_v23, %v1078_v53  ;;  %v1084_v56 = vshrl.u32 %v1024_v33, 16  ;;  %v1085_v23 = vshrl.u32 %v1066_v52, 16 }
  0xd0   : > { %v1230_v19 = vcombine.high %v1227_v13, %v5240_v3  ;;  %v1569_v53 = vshrl.u32 %v4183_v29, 16 }
  0xd1   : > { %1276 = vrot.lane.b32.xlu0 %v1255_v22, %s3625_s23  ;;  %1270 = vrot.lane.b32.xlu1 %v1246_v10, %s3623_s20  ;;  %v4288_v22 = vrot.slane %v1655_v43, %v3857_v50  ;;  %v4292_v10 = vpop.permute.xlu0 %942  ;;  %v1570_v43 = vshrl.u32 %v4187_v30, 16  ;;  %v1086_v30 = vpack.i.b16 %v1085_v23, %v1084_v56 }
  0xd2   : > { %v1260_v40 = vshrl.u32 %v1230_v19, 16 }
  0xd3   : > { %v1725_v13 = vpack.i.b16 %v4285_v35, %v4288_v22  ;;  %v1571_v29 = vpack.i.b16 %v1570_v43, %v1569_v53  ;;  %v4325_v53 = vpop.permute.xlu1 %420 }
  0xd4   : > { %v1261_v33 = vpack.i.b16 %v1260_v40, %v1259_v36  ;;  %v1266_v36 = vshrl.u32 %v4266_v57, 16 }
  0xd5   : > { %1272 = vrot.lane.b32.xlu0 %v1249_v7, %s3624_s21  ;;  %1105 = vrot.lane.b32.xlu1 %v1080_v26, %s3622_s18  ;;  %v4311_v52 = vpop.permute.xlu0 %944  ;;  %v1050_v7 = vcombine.high %v4194_v48, %v4202_v38  ;;  %v3365_v48 = vcombine.high %v4093_v21, %v4105_v54  ;;  %v3364_v38 = vcombine.high %v4095_v42, %v4107_v49 }
  0xd7   : > { %v1064_v56 = vrot.slane %v1050_v7, %v3857_v50  ;;  %v4353_v42 = vrot.slane %v3365_v48, %v3857_v50  ;;  %v4356_v49 = vrot.slane %v3364_v38, %v3857_v50 }
  0xd9   : > { %1282 = vrot.lane.b32.xlu0 %v1264_v59, %s5225_s10  ;;  %1107 = vrot.lane.b32.xlu1 %v1083_v15, %s3623_s20  ;;  %v1008_v59 = vcombine.high %v4198_v1, %v4206_v39  ;;  %v1258_v15 = vpack.i.b16 %v1230_v19, %v1188_v60  ;;  %v4319_v26 = vpop.permute.xlu0 %946  ;;  %v5244_v1 = vpack.i.b16 %v3971_v14, %v3968_v12  ;;  %v1091_v54 = vshrl.u32 %v1064_v56, 16  ;;  %v4345_v12 = vpop.permute.xlu1 %422 }
  0xda   : > { %v1535_v39 = vcombine.high %v4133_v31, %v4151_v24  ;;  %v1493_v60 = vcombine.high %v4141_v44, %v4158_v25  ;;  %v5245_v14 = vpack.i.b16 %v3996_v37, %v3988_v34  ;;  %v1101_v34 = vpack.i.b16 %v4353_v42, %v4356_v49 }
  0xdb   : > { %v1022_v23 = vrot.slane %v1008_v59, %v3857_v50 }
  0xdc   : > { %v1549_v31 = vrot.slane %v1535_v39, %v3857_v50  ;;  %v3371_v39 = vcombine.high %v4119_v11, %v4145_v45  ;;  %v5246_v11 = vpack.i.b16 %v4018_v47, %v4014_v2  ;;  %v1656_v45 = vcombine.high %v4253_v63, %v4261_v9 }
  0xdd   : > { %1594 = vrot.lane.b32.xlu0 %v1571_v29, %s3624_s21  ;;  %1109 = vrot.lane.b32.xlu1 %v1086_v30, %s3624_s21  ;;  %v1089_v19 = vpack.i.b16 %v1064_v56, %v1022_v23  ;;  %v4341_v40 = vpop.permute.xlu0 %426  ;;  %v1090_v21 = vshrl.u32 %v1022_v23, 16  ;;  %v4366_v37 = vpop.permute.xlu1 %424  ;;  %v1025_v7 = vcombine.high %v1022_v23, %v5240_v3  ;;  %v1714_v2 = vcombine.high %v4285_v35, %v5240_v3 }
  0xde   : > { %v1552_v43 = vcombine.high %v1549_v31, %v5240_v3  ;;  %v1670_v63 = vrot.slane %v1656_v45, %v3857_v50 }
  0xdf   : > { %v1092_v57 = vpack.i.b16 %v1091_v54, %v1090_v21  ;;  %v1096_v48 = vshrl.u32 %v1025_v7, 16  ;;  %v1576_v54 = vshrl.u32 %v1549_v31, 16 }
  0xe1   : > { %1278 = vrot.lane.b32.xlu0 %v1258_v15, %s3628_s16  ;;  %1280 = vrot.lane.b32.xlu1 %v1261_v33, %s3619_s17  ;;  %v4360_v24 = vpop.permute.xlu0 %948  ;;  %v1067_v33 = vcombine.high %v1064_v56, %v5240_v3  ;;  %v1582_v15 = vshrl.u32 %v1552_v43, 16  ;;  %v4377_v38 = vpop.permute.xlu1 %428 }
  0xe3   : > { %v1095_v21 = vpack.i.b16 %v1067_v33, %v1025_v7  ;;  %v1102_v7 = vshrl.u32 %v4356_v49, 16 }
  0xe5   : > { %1435 = vrot.lane.b32.xlu0 %v3985_v28, %s3625_s23  ;;  %1433 = vrot.lane.b32.xlu1 %v5244_v1, %s3626_s9  ;;  %v1265_v28 = vshrl.u32 %v4269_v58, 16  ;;  %v1507_v58 = vrot.slane %v1493_v60, %v3857_v50  ;;  %v4375_v30 = vpop.permute.xlu0 %1427  ;;  %v1097_v1 = vshrl.u32 %v1067_v33, 16  ;;  %v1103_v33 = vshrl.u32 %v4353_v42, 16 }
  0xe6   : > { %v1673_v42 = vcombine.high %v1670_v63, %v5240_v3 }
  0xe7   : > { %v1267_v44 = vpack.i.b16 %v1266_v36, %v1265_v28  ;;  %v1510_v25 = vcombine.high %v1507_v58, %v5240_v3  ;;  %v1574_v29 = vpack.i.b16 %v1549_v31, %v1507_v58  ;;  %v1098_v23 = vpack.i.b16 %v1097_v1, %v1096_v48  ;;  %v5249_v48 = vld [vmem:[#allocation14_spill] sm:$0xff] }
  0xe8   : > { %v1559_v28 = vrot.slane %v3371_v39, %v3857_v50  ;;  %v1104_v49 = vpack.i.b16 %v1103_v33, %v1102_v7  ;;  %v1744_v45 = vshrl.u32 %v1673_v42, 16 }
  0xe9   : > { %1441 = vrot.lane.b32.xlu0 %v5245_v14, %s5225_s10  ;;  %1111 = vrot.lane.b32.xlu1 %v1089_v19, %s3626_s9  ;;  %v1581_v59 = vshrl.u32 %v1510_v25, 16  ;;  %v4386_v60 = vpop.permute.xlu0 %432  ;;  %v4390_v19 = vpop.permute.xlu1 %434  ;;  %v1727_v14 = vshrl.u32 %v4285_v35, 16 }
  0xeb   : > { %v1583_v56 = vpack.i.b16 %v1582_v15, %v1581_v59  ;;  %v5248_v15 = vld [vmem:[#allocation15_spill] sm:$0xff] }
  0xec   : > { %v3372_v1 = vcombine.high %v5249_v48, %v5248_v15 }
  0xed   : > { %1113 = vrot.lane.b32.xlu0 %v1092_v57, %s3625_s23  ;;  %1284 = vrot.lane.b32.xlu1 %v1267_v44, %s3629_s22  ;;  %v4405_v31 = vpop.permute.xlu0 %950  ;;  %v1672_v44 = vcombine.high %v4288_v22, %v5240_v3  ;;  %v4411_v47 = vpop.permute.xlu1 %954 }
  0xf1   : > { %1119 = vrot.lane.b32.xlu0 %v1101_v34, %s5225_s10  ;;  %1439 = vrot.lane.b32.xlu1 %v4028_v62, %s3619_s17  ;;  %v3370_v62 = vcombine.high %v4121_v18, %v4153_v46  ;;  %v1698_v18 = vcombine.high %v4243_v20, %v4257_v6  ;;  %v1726_v46 = vshrl.u32 %v4288_v22, 16  ;;  %v4417_v34 = vpop.permute.xlu0 %956 }
  0xf3   : > { %v1517_v36 = vrot.slane %v3370_v62, %v3857_v50  ;;  %v1712_v20 = vrot.slane %v1698_v18, %v3857_v50  ;;  %v1728_v6 = vpack.i.b16 %v1727_v14, %v1726_v46  ;;  %v1588_v62 = vshrl.u32 %v1559_v28, 16 }
  0xf4   : > { %v1680_v18 = vrot.slane %v3372_v1, %v3857_v50 }
  0xf5   : > { %1443 = vrot.lane.b32.xlu0 %v4026_v61, %s3629_s22  ;;  %1596 = vrot.lane.b32.xlu1 %v1574_v29, %s3626_s9  ;;  %v1575_v61 = vshrl.u32 %v1507_v58, 16  ;;  %v1580_v58 = vpack.i.b16 %v1552_v43, %v1510_v25  ;;  %v1586_v9 = vpack.i.b16 %v1559_v28, %v1517_v36  ;;  %v1732_v25 = vshrl.u32 %v1672_v44, 16  ;;  %v5247_v29 = vld [vmem:[#allocation13_spill] sm:$0xff] }
  0xf6   : > { %v1733_v43 = vshrl.u32 %v1714_v2, 16  ;;  %v3373_v59 = vcombine.high %v5247_v29, %v4245_v55  ;;  %v1587_v39 = vshrl.u32 %v1517_v36, 16  ;;  %v4431_v55 = vpop.permute.xlu0 %436  ;;  %v1737_v29 = vpack.i.b16 %v1712_v20, %v1670_v63 }
  0xf7   : > { %v1577_v57 = vpack.i.b16 %v1576_v54, %v1575_v61  ;;  %v1715_v54 = vcombine.high %v1712_v20, %v5240_v3 }
  0xf8   : > { %v1734_v61 = vpack.i.b16 %v1733_v43, %v1732_v25  ;;  %v1589_v28 = vpack.i.b16 %v1588_v62, %v1587_v39  ;;  %v1731_v25 = vpack.i.b16 %v1714_v2, %v1672_v44 }
  0xf9   : > { %1602 = vrot.lane.b32.xlu0 %v1583_v56, %s3619_s17  ;;  %1117 = vrot.lane.b32.xlu1 %v1098_v23, %s3619_s17  ;;  %v1738_v56 = vshrl.u32 %v1670_v63, 16  ;;  %v1739_v23 = vshrl.u32 %v1712_v20, 16  ;;  %v1745_v46 = vshrl.u32 %v1715_v54, 16  ;;  %v1743_v2 = vpack.i.b16 %v1715_v54, %v1673_v42  ;;  %v1894_v20 = vld [vmem:[%s5200_s2] sm:$0x3]  ;;  %v5250_v42 = vld [vmem:[#allocation10_spill] sm:$0xff] }
  0xfa   : > { %v5251_v54 = vld [vmem:[#allocation9_spill] sm:$0xff] }
  0xfb   : > { %v1740_v36 = vpack.i.b16 %v1739_v23, %v1738_v56 }
  0xfd   : > { %1115 = vrot.lane.b32.xlu0 %v1095_v21, %s3628_s16  ;;  %1437 = vrot.lane.b32.xlu1 %v5246_v11, %s3628_s16  ;;  %v4427_v21 = vpop.permute.xlu1 %1429  ;;  %v1722_v11 = vrot.slane %v3373_v59, %v3857_v50  ;;  %v1902_v59 = vld [vmem:[%s5201_s3] sm:$0x3] }
  0xff   : > { %v1749_v56 = vpack.i.b16 %v1722_v11, %v1680_v18 }
 0x101   : > { %1600 = vrot.lane.b32.xlu0 %v1580_v58, %s3628_s16  ;;  %1598 = vrot.lane.b32.xlu1 %v1577_v57, %s3625_s23  ;;  %v4437_v14 = vpop.permute.xlu1 %430  ;;  %v1751_v58 = vshrl.u32 %v1722_v11, 16  ;;  %v1750_v57 = vshrl.u32 %v1680_v18, 16 }
 0x103   : > { %v1752_v33 = vpack.i.b16 %v1751_v58, %v1750_v57 }
 0x105   : > { %1753 = vrot.lane.b32.xlu0 %v1728_v6, %s3622_s18  ;;  %1604 = vrot.lane.b32.xlu1 %v1586_v9, %s5225_s10  ;;  %v4441_v6 = vpop.permute.xlu0 %958  ;;  %v1746_v9 = vpack.i.b16 %v1745_v46, %v1744_v45  ;;  %v953_v43 = vpop.permute.xlu1 %952  ;;  %v5253_v45 = vld [vmem:[#allocation8_spill] sm:$0xff]  ;;  %v5254_v46 = vld [vmem:[#allocation7_spill] sm:$0xff]  ;;  %s3631_s18 = smov 2  }
 0x106   : > { %v5255_v58 = vpack.i.b16 %v5253_v45, %v5254_v46 }
 0x108   : > { %v441_v57 = vsel %vm438_vm0, %v5255_v58, %v4325_v53 }
 0x109   : > { %1757 = vrot.lane.b32.xlu0 %v1734_v61, %s3624_s21  ;;  %1121 = vrot.lane.b32.xlu1 %v1104_v49, %s3629_s22  ;;  %v4452_v15 = vpop.permute.xlu1 %1431  ;;  %s3632_s21 = smov 74  }
 0x10d   : > { %1761 = vrot.lane.b32.xlu0 %v1740_v36, %s3625_s23  ;;  %1606 = vrot.lane.b32.xlu1 %v1589_v28, %s3629_s22  ;;  %v5252_v36 = vpack.i.b16 %v5250_v42, %v5251_v54  ;;  %s5228_s23 = smov 112  }
 0x10f   : > { %v962_v11 = vsel %vm438_vm0, %v5252_v36, %v4292_v10 }
 0x111   : > { %1765 = vrot.lane.b32.xlu0 %v1746_v9, %s3619_s17  ;;  %1755 = vrot.lane.b32.xlu1 %v1731_v25, %s3623_s20  ;;  %v964_v9 = vsel %vm442_vm1, %v962_v11, %v4311_v52  ;;  %v444_v25 = vsel %vm442_vm1, %v441_v57, %v4345_v12  ;;  %s3634_s20 = smov 38  }
 0x112   : > { %v447_v52 = vsel %vm445_vm2, %v444_v25, %v4366_v37  ;;  %v5257_v37 = vpack.i.b16 %v4066_v8, %v4075_v16 }
 0x113   : > { %v4445_v7 = vpop.permute.xlu0 %610  ;;  %v450_v42 = vsel %vm448_vm3, %v447_v52, %v4341_v40 }
 0x114   : > { %v453_v40 = vsel %vm451_vm4, %v450_v42, %v4377_v38  ;;  %v976_v38 = vsel %vm460_vm6, %v4411_v47, %v4417_v34 }
 0x115   : > { %1769 = vrot.lane.b32.xlu0 %v1752_v33, %s3629_s22  ;;  %1759 = vrot.lane.b32.xlu1 %v1737_v29, %s3626_s9  ;;  %v966_v33 = vsel %vm445_vm2, %v964_v9, %v4319_v26  ;;  %s3630_s9 = smov 110   ;;  %s3633_s22 = smov 92  }
 0x117   : > { %v603_v44 = vpop.permute.xlu0 %602 }
 0x119   : > { %1763 = vrot.lane.b32.xlu1 %v1743_v2, %s3628_s16  ;;  %1905 = vperm.xlu0 %3500, %v1902_v59   ;;  %v5256_v59 = vpack.i.b16 %v4053_v27, %v4045_v41  ;;  %s3635_s16 = smov 56  }
 0x11b   : > { %v4455_v48 = vpop.permute.xlu0 %612  ;;  %v774_v1 = vpop.permute.xlu1 %773 }
 0x11d   : > { %1767 = vrot.lane.b32.xlu1 %v1749_v56, %s5225_s10  ;;  %v968_v56 = vsel %vm448_vm3, %v966_v33, %v4360_v24  ;;  %s3639_s10 = smov 94  }
 0x11e   : > { %v970_v41 = vsel %vm451_vm4, %v968_v56, %v4405_v31 }
 0x11f   : > { %v597_v63 = vpop.permute.xlu0 %596  ;;  %v766_v23 = vpop.permute.xlu1 %765  ;;  %v972_v36 = vsel %vm454_vm5, %v970_v41, %v953_v43 }
 0x120   : > { %v616_v2 = vsel %vm438_vm0, %v5256_v59, %v597_v63 }
 0x121   : > { %1897 = vperm.xlu1 %3499, %v1894_v20  }
 0x123   : > { %v760_v39 = vpop.permute.xlu0 %759  ;;  %v776_v62 = vpop.permute.xlu1 %775 }
 0x124   : > { %v779_v63 = vsel %vm438_vm0, %v5257_v37, %v760_v39  ;;  %v462_v39 = vsel %vm460_vm6, %v4386_v60, %v4390_v19 }
 0x125   : > { %v465_v33 = vsel %vm463_vm8, %v462_v39, %v4431_v55 }
 0x127   : > { %v605_v61 = vpop.permute.xlu0 %604  ;;  %v599_v49 = vpop.permute.xlu1 %598 }
 0x128   : > { %v618_v53 = vsel %vm442_vm1, %v616_v2, %v599_v49 }
 0x12b   : > { %v770_v18 = vpop.permute.xlu0 %769  ;;  %v762_v28 = vpop.permute.xlu1 %761 }
 0x12c   : > { %v781_v24 = vsel %vm442_vm1, %v779_v63, %v762_v28 }
 0x12f   : > { %v601_v10 = vpop.permute.xlu0 %600  ;;  %v607_v29 = vpop.permute.xlu1 %606 }
 0x130   : > { %v620_v12 = vsel %vm445_vm2, %v618_v53, %v601_v10 }
 0x131   : > { %v622_v27 = vsel %vm448_vm3, %v620_v12, %v603_v44 }
 0x132   : > { %v624_v31 = vsel %vm451_vm4, %v622_v27, %v605_v61  ;;  %v456_v61 = vsel %vm454_vm5, %v453_v40, %v4437_v14  ;;  %v978_v14 = vsel %vm463_vm8, %v976_v38, %v4441_v6 }
 0x133   : > { %v772_v26 = vpop.permute.xlu0 %771  ;;  %v768_v20 = vpop.permute.xlu1 %767  ;;  %v459_v9 = vsel %vm457_vm7, %v456_v61, %v4386_v60  ;;  %v1801_v6 = vrot.slane %v978_v14, 2 }
 0x134   : > { %v793_v8 = vsel %vm460_vm6, %v772_v26, %v774_v1  ;;  %v974_v1 = vsel %vm457_vm7, %v972_v36, %v4411_v47 }
 0x135   : > { %v795_v45 = vsel %vm463_vm8, %v793_v8, %v776_v62  ;;  %v1800_v62 = vrot.slane %v974_v1, 2  ;;  %v5258_v8 = vpack.i.b16 %v4176_v51, %v4190_v4  ;;  %v5259_v1 = vld [vmem:[#allocation12_spill] sm:$0xff] }
 0x137   : > { %v4497_v49 = vpop.permute.xlu0 %1590  ;;  %v764_v54 = vpop.permute.xlu1 %763 }
 0x138   : > { %v783_v44 = vsel %vm445_vm2, %v781_v24, %v764_v54 }
 0x139   : > { %v785_v16 = vsel %vm448_vm3, %v783_v44, %v766_v23  ;;  %v626_v23 = vsel %vm454_vm5, %v624_v31, %v607_v29 }
 0x13a   : > { %v787_v43 = vsel %vm451_vm4, %v785_v16, %v768_v20 }
 0x13b   : > { %v789_v11 = vsel %vm454_vm5, %v787_v43, %v770_v18  ;;  %v4519_v28 = vpop.permute.xlu0 %1592  ;;  %v609_v19 = vpop.permute.xlu1 %608 }
 0x13c   : > { %v628_v34 = vsel %vm457_vm7, %v626_v23, %v609_v19  ;;  %v630_v46 = vsel %vm460_vm6, %v609_v19, %v4445_v7  ;;  %v791_v58 = vsel %vm457_vm7, %v789_v11, %v772_v26  ;;  %v1797_v7 = vrot.slane %v795_v45, 4  ;;  %v5260_v23 = vld [vmem:[#allocation11_spill] sm:$0xff] }
 0x13d   : > { %v632_v47 = vsel %vm463_vm8, %v630_v46, %v4455_v48  ;;  %v1792_v57 = vrot.slane %v628_v34, 6  ;;  %v1796_v18 = vrot.slane %v791_v58, 4  ;;  %v5261_v11 = vpack.i.b16 %v5259_v1, %v5260_v23 }
 0x13e   : > { %v1793_v25 = vrot.slane %v632_v47, 6  ;;  %v5262_v47 = vpack.i.b16 %v4228_v0, %v4231_v5  ;;  %v5263_v5 = vpack.i.b16 %v4169_v32, %v4172_v17 }
 0x13f   : > { %v1275_v10 = vpop.permute.xlu0 %1274  ;;  %v1269_v29 = vpop.permute.xlu1 %1268  ;;  %v1816_v59 = vsel %vm1814_vm9, %v459_v9, %v1792_v57  ;;  %v1447_v19 = vsel %vm438_vm0, %v5261_v11, %v4375_v30 }
 0x140   : > { %v1818_v2 = vsel %vm1814_vm9, %v465_v33, %v1793_v25  ;;  %v1821_v48 = vsel %vm1819_vm10, %v1816_v59, %v1796_v18  ;;  %v1288_v16 = vsel %vm438_vm0, %v5258_v8, %v1269_v29  ;;  %v1449_v51 = vsel %vm442_vm1, %v1447_v19, %v4427_v21 }
 0x141   : > { %v1823_v53 = vsel %vm1819_vm10, %v1818_v2, %v1797_v7  ;;  %v1826_v60 = vsel %vm1824_vm11, %v1821_v48, %v1800_v62  ;;  %v1451_v14 = vsel %vm445_vm2, %v1449_v51, %v4452_v15  ;;  %v1610_v29 = vsel %vm438_vm0, %v5263_v5, %v4497_v49 }
 0x142   : > { %v1829_v52 = vsel %vm1824_vm11, %v1823_v53, %v1801_v6  ;;  %v1612_v48 = vsel %vm442_vm1, %v1610_v29, %v4519_v28 }
 0x143   : > { %v1277_v56 = vpop.permute.xlu0 %1276  ;;  %1853 = vmatprep.subr.bf16.mxu0 %v1829_v52  ;;  %v1271_v12 = vpop.permute.xlu1 %1270 }
 0x144   : > { %1854 = vmatpush1.bf16.msra.mxu0 %v1826_v60  ;;  %v1290_v39 = vsel %vm442_vm1, %v1288_v16, %v1271_v12 }
 0x147   : > { %v1273_v55 = vpop.permute.xlu0 %1272  ;;  %v1106_v26 = vpop.permute.xlu1 %1105 }
 0x148   : > { %v1292_v38 = vsel %vm445_vm2, %v1290_v39, %v1273_v55  ;;  %v1125_v57 = vsel %vm438_vm0, %v5262_v47, %v1106_v26 }
 0x149   : > { %v1294_v45 = vsel %vm448_vm3, %v1292_v38, %v1275_v10 }
 0x14a   : > { %v1296_v4 = vsel %vm451_vm4, %v1294_v45, %v1277_v56 }
 0x14b   : > { %v1283_v20 = vpop.permute.xlu0 %1282  ;;  %v1108_v42 = vpop.permute.xlu1 %1107 }
 0x14c   : > { %v1127_v9 = vsel %vm442_vm1, %v1125_v57, %v1108_v42 }
 0x14f   : > { %v1595_v41 = vpop.permute.xlu0 %1594  ;;  %v1110_v27 = vpop.permute.xlu1 %1109 }
 0x150   : > { %v1129_v21 = vsel %vm445_vm2, %v1127_v9, %v1110_v27  ;;  %v1614_v52 = vsel %vm445_vm2, %v1612_v48, %v1595_v41 }
 0x153   : > { %v1279_v37 = vpop.permute.xlu0 %1278  ;;  %v1281_v63 = vpop.permute.xlu1 %1280 }
 0x154   : > { %v1298_v58 = vsel %vm454_vm5, %v1296_v4, %v1279_v37  ;;  %v1302_v41 = vsel %vm460_vm6, %v1281_v63, %v1283_v20 }
 0x155   : > { %v1300_v62 = vsel %vm457_vm7, %v1298_v58, %v1281_v63 }
 0x156   : > { %v1804_v59 = vrot.slane %v1300_v62, 6  ;;  %v1845_v62 = vld [vmem:[%s5199_s1] sm:$0x1] }
 0x157   : > { %v1436_v24 = vpop.permute.xlu0 %1435  ;;  %v1434_v54 = vpop.permute.xlu1 %1433 }
 0x158   : > { %v1453_v25 = vsel %vm448_vm3, %v1451_v14, %v1434_v54 }
 0x159   : > { %v1455_v10 = vsel %vm451_vm4, %v1453_v25, %v1436_v24 }
 0x15b   : > { %v1442_v40 = vpop.permute.xlu0 %1441  ;;  %v1112_v36 = vpop.permute.xlu1 %1111 }
 0x15c   : > { %v1131_v33 = vsel %vm448_vm3, %v1129_v21, %v1112_v36 }
 0x15f   : > { %v1114_v31 = vpop.permute.xlu0 %1113  ;;  %v1285_v44 = vpop.permute.xlu1 %1284 }
 0x160   : > { %v1133_v7 = vsel %vm451_vm4, %v1131_v33, %v1114_v31  ;;  %v1304_v36 = vsel %vm463_vm8, %v1302_v41, %v1285_v44 }
 0x161   : > { %v1805_v38 = vrot.slane %v1304_v36, 6 }
 0x163   : > { %v1120_v43 = vpop.permute.xlu0 %1119  ;;  %v1440_v61 = vpop.permute.xlu1 %1439 }
 0x164   : > { %v1461_v16 = vsel %vm460_vm6, %v1440_v61, %v1442_v40 }
 0x167   : > { %v1444_v34 = vpop.permute.xlu0 %1443  ;;  %v1597_v46 = vpop.permute.xlu1 %1596 }
 0x168   : > { %v1616_v32 = vsel %vm448_vm3, %v1614_v52, %v1597_v46  ;;  %v1463_v1 = vsel %vm463_vm8, %v1461_v16, %v1444_v34  ;;  %v5266_v16 = vlaneseq }
 0x169   : > { %v1809_v63 = vrot.slane %v1463_v1, 4 }
 0x16b   : > { %v1603_v30 = vpop.permute.xlu0 %1602  ;;  %v1118_v18 = vpop.permute.xlu1 %1117 }
 0x16c   : > { %v1139_v31 = vsel %vm460_vm6, %v1118_v18, %v1120_v43 }
 0x16f   : > { %v1116_v15 = vpop.permute.xlu0 %1115  ;;  %v1438_v0 = vpop.permute.xlu1 %1437 }
 0x170   : > { %v1135_v6 = vsel %vm454_vm5, %v1133_v7, %v1116_v15  ;;  %v1457_v2 = vsel %vm454_vm5, %v1455_v10, %v1438_v0 }
 0x171   : > { %v1137_v53 = vsel %vm457_vm7, %v1135_v6, %v1118_v18  ;;  %v1459_v60 = vsel %vm457_vm7, %v1457_v2, %v1440_v61 }
 0x172   : > { %v1808_v56 = vrot.slane %v1459_v60, 4  ;;  %v1832_v12 = vsel %vm1814_vm9, %v1137_v53, %v1804_v59 }
 0x173   : > { %v1601_v17 = vpop.permute.xlu0 %1600  ;;  %v1599_v49 = vpop.permute.xlu1 %1598 }
 0x174   : > { %v1618_v55 = vsel %vm451_vm4, %v1616_v32, %v1599_v49  ;;  %v1836_v26 = vsel %vm1819_vm10, %v1832_v12, %v1808_v56 }
 0x175   : > { %v1620_v42 = vsel %vm454_vm5, %v1618_v55, %v1601_v17 }
 0x176   : > { %v1622_v28 = vsel %vm457_vm7, %v1620_v42, %v1603_v30 }
 0x177   : > { %v1605_v27 = vpop.permute.xlu1 %1604  ;;  %v1812_v37 = vrot.slane %v1622_v28, 2  ;;  %v1754_v24 = vpop.permute.xlu0 %1753 }
 0x178   : > { %v1624_v11 = vsel %vm460_vm6, %v1603_v30, %v1605_v27  ;;  %v1773_v40 = vsel %vm438_vm0, %v1725_v13, %v1754_v24 }
 0x179   : > { %v1840_v54 = vsel %vm1824_vm11, %v1836_v26, %v1812_v37  ;;  %v3637_v26 = vmov 0.0   ;;  %v5265_v37 = vld [vmem:[#allocation5_spill] sm:$0xff] }
 0x17a   : > { %3390 = vmatprep.subr.bf16.mxu1 %v3637_v26  ;;  %v2018_v24 = vadd.s32 8, %v5265_v37 }
 0x17b   : > { %v1122_v8 = vpop.permute.xlu1 %1121  ;;  %v1758_v23 = vpop.permute.xlu0 %1757 }
 0x17c   : > { %v1141_v39 = vsel %vm463_vm8, %v1139_v31, %v1122_v8 }
 0x17d   : > { %v1834_v19 = vsel %vm1814_vm9, %v1141_v39, %v1805_v38  ;;  %v2024_v39 = vand.u32 127, %v5266_v16 }
 0x17e   : > { %v1838_v43 = vsel %vm1819_vm10, %v1834_v19, %v1809_v63  ;;  %v5267_v63 = vld [vmem:[#allocation6_spill] sm:$0xff] }
 0x17f   : > { %v1607_v20 = vpop.permute.xlu1 %1606  ;;  %v1762_v46 = vpop.permute.xlu0 %1761 }
 0x180   : > { %v1626_v45 = vsel %vm463_vm8, %v1624_v11, %v1607_v20  ;;  %v3379_v20 = vadd.s32 4294967295, %v2024_v39 }
 0x181   : > { %v1813_v44 = vrot.slane %v1626_v45, 2 }
 0x183   : > { %v1756_v61 = vpop.permute.xlu1 %1755  ;;  %v1843_v34 = vsel %vm1824_vm11, %v1838_v43, %v1813_v44  ;;  %v1766_v47 = vpop.permute.xlu0 %1765 }
 0x184   : > { %v1775_v51 = vsel %vm442_vm1, %v1773_v40, %v1756_v61  ;;  %1855 = vmatprep.subr.bf16.mxu0 %v1843_v34 }
 0x185   : > { %1856 = vmatpush1.bf16.msra.mxu0 %v1840_v54  ;;  %v1777_v4 = vsel %vm445_vm2, %v1775_v51, %v1758_v23 }
 0x187   : > { %v1760_v58 = vpop.permute.xlu1 %1759  ;;  %v1770_v18 = vpop.permute.xlu0 %1769 }
 0x188   : > { %v1779_v14 = vsel %vm448_vm3, %v1777_v4, %v1760_v58 }
 0x189   : > { %v1781_v57 = vsel %vm451_vm4, %v1779_v14, %v1762_v46  ;;  %vm2032_vm4 = vcmp.ge.s32.totalorder %v3379_v20, 0 }
 0x18b   : > { %v1764_v30 = vpop.permute.xlu1 %1763 }
 0x18c   : > { %v1783_v35 = vsel %vm454_vm5, %v1781_v57, %v1764_v30 }
 0x18d   : > { %v1785_v13 = vsel %vm457_vm7, %v1783_v35, %v1766_v47 }
 0x18e   : > { %v1849_v21 = vsel %vm1814_vm9, %v1785_v13, 0 }
 0x18f   : > { %v1768_v22 = vpop.permute.xlu1 %1767 }
 0x190   : > { %v1787_v9 = vsel %vm460_vm6, %v1766_v47, %v1768_v22 }
 0x191   : > { %v1789_v25 = vsel %vm463_vm8, %v1787_v9, %v1770_v18  ;;  %vm2035_vm8 = vcmp.lt.s32.totalorder %v3379_v20, 16 }
 0x192   : > { %3374 = vmatprep.subr.msk.bf16.mxu0 %vm1814_vm9, %v1789_v25 }
 0x193   : > { %1858 = vmatpush1.bf16.msra.mxu0 %v1849_v21 }
 0x196   : > { %3375 = vmatmul.mubr.msk.bf16.vlgmr.msra.gmra.mrb[0].mxu0 %vm442_vm1, %v1845_v62 }
 0x198   : > { %v1906_v15 = vpop.permute.xlu0 %1905 }
 0x1a0   : > { %v1898_v33 = vpop.permute.xlu1 %1897 }
 0x269   : > { %v1887_v7 = vpop.f32.mrb[0].mxu0 }
 0x26a   : > { %v1900_v10 = vmul.f32 %v1898_v33, %v1887_v7  ;;  %v1889_v0 = vpop.f32.mrb[1].mxu0 }
 0x26b   : > { %v1901_v5 = vmul.f32 %v1898_v33, %v1889_v0  ;;  %v1891_v29 = vpop.f32.mrb[2].mxu0 }
 0x26c   : > { %v1908_v59 = vadd.f32 %v1906_v15, %v1900_v10  ;;  %v1892_v6 = vpop.f32.mrb[3].mxu0 }
 0x26d   : > { %v1909_v2 = vadd.f32 %v1906_v15, %v1901_v5 }
 0x26e   : > { %v3376_v48 = vmul.f32 -1.442695, %v1908_v59 }
 0x26f   : > { %v3377_v53 = vmul.f32 -1.442695, %v1909_v2 }
 0x270   : > { %3501 = vpow2.f32 %v3376_v48 }
 0x271   : > { %3503 = vpow2.f32 %v3377_v53 }
 0x27a   : > { %v3502_v60 = vpop.eup %3501 }
 0x27b   : > { %v1916_v52 = vadd.f32 1.0, %v3502_v60  ;;  %v3504_v56 = vpop.eup %3503 }
 0x27c   : > { %v1917_v12 = vadd.f32 1.0, %v3504_v56 }
 0x27d   : > { %3505 = vrcp.f32 %v1916_v52 }
 0x27e   : > { %3507 = vrcp.f32 %v1917_v12 }
 0x287   : > { %v3506_v32 = vpop.eup %3505 }
 0x288   : > { %v1922_v17 = vmul.f32 %v3506_v32, %v1908_v59  ;;  %v3508_v49 = vpop.eup %3507 }
 0x289   : > { %v1923_v55 = vmul.f32 %v3508_v49, %v1909_v2 }
 0x28a   : > { %1925 = vrot.lane.b32.xlu0 %v1922_v17, %s3630_s9  ;;  %1944 = vrot.lane.b32.xlu1 %v1922_v17, %s3631_s18  ;;  %s3638_s9 = smov 20  }
 0x28e   : > { %1931 = vrot.lane.b32.xlu0 %v1922_v17, %s3632_s21  ;;  %1928 = vrot.lane.b32.xlu1 %v1922_v17, %s3633_s22  ;;  %s5264_s21 = sshll.u32 %s3599_s27, 3 }
 0x28f   : > { %s3378_s22 = sadd.s32 4294967295, %s5264_s21  ;;  %s5227_s21 = smov 80  }
 0x290   : > { %v2020_v41 = vstv %s3378_s22  ;;  %s5229_s22 = smov 96  }
 0x291   : > { %v2021_v31 = vadd.s32 %v2020_v41, %v5265_v37  ;;  %v2022_v8 = vadd.s32 %v2020_v41, %v2018_v24 }
 0x292   : > { %1937 = vrot.lane.b32.xlu0 %v1922_v17, %s3634_s20  ;;  %1934 = vrot.lane.b32.xlu1 %v1922_v17, %s3635_s16  ;;  %s3640_s20 = smov 64   ;;  %s3641_s16 = smov 32  }
 0x293   : > { %vm2026_vm13 = vcmp.ge.s32.totalorder %v2021_v31, 0  ;;  %vm2027_vm14 = vcmp.ge.s32.totalorder %v2022_v8, 0  ;;  %vm2028_vm15 = vcmp.lt.s32.totalorder %v2021_v31, 16  ;;  %vm2029_vm1 = vcmp.lt.s32.totalorder %v2022_v8, 16 }
 0x294   : > { %vm2030_vm2 = vmand %vm2026_vm13, %vm2028_vm15  ;;  %vm2140_vm15 = vcmask 392192  }
 0x295   : > { %vm2031_vm3 = vmand %vm2027_vm14, %vm2029_vm1  ;;  %vm2137_vm14 = vcmask 261120   ;;  %vm2143_vm1 = vcmask 523264  }
 0x296   : > { %1951 = vrot.lane.b32.xlu0 %v1923_v55, %s5228_s23  ;;  %1946 = vrot.lane.b32.xlu1 %v1923_v55, %s3631_s18  ;;  %vm2033_vm5 = vmand %vm2030_vm2, %vm2032_vm4  ;;  %s5269_s18 = smov 16   ;;  %vm2146_vm2 = vcmask 654336  }
 0x297   : > { %vm2034_vm7 = vmand %vm2031_vm3, %vm2032_vm4  ;;  %vm2149_vm3 = vcmask 785408   ;;  %vm2152_vm4 = vcmask 916480  }
 0x298   : > { %vm2037_vm13 = vmand %vm2034_vm7, %vm2035_vm8  ;;  %vm3035_vm7 = vcmask 1040384  }
 0x29a   : > { %1940 = vrot.lane.b32.xlu1 %v1922_v17, %s3638_s9  ;;  %s3642_s9 = smov 48  }
 0x29e   : > { %1953 = vrot.lane.b32.xlu1 %v1923_v55, %s3639_s10  ;;  %s5268_s10 = smov 127  }
 0x2fc   : > { %v1945_v42 = vpop.permute.xlu1 %1944  ;;  %v1926_v28 = vpop.permute.xlu0 %1925 }
 0x300   : > { %v1929_v27 = vpop.permute.xlu1 %1928  ;;  %v1932_v54 = vpop.permute.xlu0 %1931 }
 0x301   : > { %v1963_v38 = vcombine.low %v1926_v28, %v1932_v54  ;;  %v1955_v1 = vcombine.low %v1922_v17, %v1929_v27 }
 0x303   : > { %v1970_v45 = vrot.slane %v1963_v38, %v5267_v63  ;;  %v1962_v44 = vrot.slane %v1955_v1, %v5267_v63 }
 0x304   : > { %v1935_v36 = vpop.permute.xlu1 %1934  ;;  %v1938_v19 = vpop.permute.xlu0 %1937 }
 0x305   : > { %v1987_v34 = vcombine.low %v1962_v44, %v1970_v45 }
 0x307   : > { %v1994_v57 = vrot.slane %v1987_v34, %v3857_v50 }
 0x308   : > { %v1947_v23 = vpop.permute.xlu1 %1946  ;;  %v1952_v4 = vpop.permute.xlu0 %1951 }
 0x309   : > { %v1949_v11 = vsel %vm1948_vm12, %v1945_v42, %v1947_v23  ;;  %vm2036_vm12 = vmand %vm2033_vm5, %vm2035_vm8  ;;  %vm3645_vm5 = vmmov 0   ;;  %vm3040_vm8 = vcmask 1042432  }
 0x30a   : > { %v1979_v43 = vcombine.low %v1938_v19, %v1949_v11  ;;  %3394 = vmatprep.mubr.msk.bf16.mxu1 %vm3645_vm5, %v3637_v26 }
 0x30c   : > { %v1941_v40 = vpop.permute.xlu1 %1940  ;;  %v1986_v46 = vrot.slane %v1979_v43, %v5267_v63 }
 0x30d   : > { %v1971_v61 = vcombine.low %v1935_v36, %v1941_v40 }
 0x30f   : > { %v1978_v51 = vrot.slane %v1971_v61, %v5267_v63 }
 0x310   : > { %v1954_v58 = vpop.permute.xlu1 %1953 }
 0x311   : > { %v1995_v14 = vcombine.low %v1978_v51, %v1986_v46  ;;  %v2007_v47 = vcombine.low %v1952_v4, %v1954_v58 }
 0x313   : > { %v2002_v30 = vrot.slane %v1995_v14, %v3857_v50  ;;  %v2014_v35 = vrot.slane %v2007_v47, %v3857_v50 }
 0x315   : > { %v2004_v22 = vcombine.high %v1994_v57, %v2002_v30  ;;  %v2003_v13 = vcombine.low %v1994_v57, %v2002_v30  ;;  %v2015_v18 = vcombine.high %v2014_v35, %v3637_v26  ;;  %v2043_v21 = vsel %vm2037_vm13, %v2014_v35, 0.0 }
 0x317   : > { %v2042_v9 = vsel %vm2036_vm12, %v2003_v13, 0.0  ;;  %v2044_v25 = vsel %vm2036_vm12, %v2004_v22, 0.0  ;;  %v2045_v62 = vsel %vm2037_vm13, %v2015_v18, 0.0 }
 0x318   : > { %v2046_v33 = vpack.c.bf16 %v2043_v21, %v2042_v9  ;;  %v2047_v7 = vpack.c.bf16 %v2045_v62, %v2044_v25 }
 0x31a   : > { %2157 = vrot.lane.b32.xlu0 %v2046_v33, %s5268_s10  ;;  %2159 = vrot.lane.b32.xlu1 %v2047_v7, %s5268_s10  ;;  %v2374_v15 = vshll.u32 %v2046_v33, 16  ;;  %v2381_v10 = vshll.u32 %v2047_v7, 16  ;;  %v2702_v0 = vrot.slane %v2046_v33, 1  ;;  %v2703_v5 = vrot.slane %v2047_v7, 1 }
 0x31b   : > { %v2372_v6 = vshrl.u32 %v2046_v33, 16  ;;  %v2379_v2 = vshrl.u32 %v2047_v7, 16  ;;  %v2054_v48 = vrot.slane %v2046_v33, %v5267_v63  ;;  %v2078_v53 = vrot.slane %v2047_v7, %v5267_v63 }
 0x31c   : > { %v2376_v29 = vrot.slane %v2374_v15, 1  ;;  %v2383_v59 = vrot.slane %v2381_v10, 1  ;;  %v2711_v49 = vrot.slane %v2702_v0, %v5267_v63  ;;  %v2736_v55 = vrot.slane %v2703_v5, %v5267_v63 }
 0x31d   : > { %v4643_v56 = vrot.slane %v2054_v48, %v3857_v50  ;;  %v4646_v12 = vrot.slane %v2078_v53, %v3857_v50  ;;  %v2055_v32 = vcombine.high %v2054_v48, %v5240_v3  ;;  %v2079_v17 = vcombine.high %v2078_v53, %v5240_v3 }
 0x31e   : > { %2264 = vrot.lane.b32.xlu0 %v2046_v33, %s3619_s17  ;;  %2266 = vrot.lane.b32.xlu1 %v2047_v7, %s3619_s17  ;;  %v2377_v60 = vor.u32 %v2376_v29, %v2372_v6  ;;  %v2384_v52 = vor.u32 %v2383_v59, %v2379_v2  ;;  %v4665_v31 = vrot.slane %v2711_v49, %v3857_v50 }
 0x31f   : > { %v2099_v27 = vshrl.u32 %v4643_v56, 16  ;;  %v2100_v37 = vshrl.u32 %v4646_v12, 16  ;;  %v2069_v24 = vrot.slane %v2055_v32, %v3857_v50  ;;  %v2093_v41 = vrot.slane %v2079_v17, %v3857_v50 }
 0x320   : > { %v2392_v42 = vrot.slane %v2377_v60, %v5267_v63  ;;  %v2417_v28 = vrot.slane %v2384_v52, %v5267_v63  ;;  %v2070_v54 = vcombine.high %v4643_v56, %v5240_v3  ;;  %v2094_v36 = vcombine.high %v4646_v12, %v5240_v3 }
 0x321   : > { %v4668_v8 = vrot.slane %v2736_v55, %v3857_v50  ;;  %v2101_v38 = vpack.i.b16 %v2100_v37, %v2099_v27  ;;  %v2110_v1 = vpack.i.b16 %v2093_v41, %v2069_v24  ;;  %v2098_v19 = vpack.i.b16 %v4646_v12, %v4643_v56 }
 0x322   : > { %2807 = vrot.lane.b32.xlu0 %v2702_v0, %s5268_s10  ;;  %2809 = vrot.lane.b32.xlu1 %v2703_v5, %s5268_s10  ;;  %v4671_v16 = vrot.slane %v2392_v42, %v3857_v50  ;;  %v4674_v39 = vrot.slane %v2417_v28, %v3857_v50  ;;  %v2105_v23 = vshrl.u32 %v2070_v54, 16  ;;  %v2106_v11 = vshrl.u32 %v2094_v36, 16 }
 0x323   : > { %v2756_v20 = vpack.i.b16 %v4668_v8, %v4665_v31  ;;  %v2104_v44 = vpack.i.b16 %v2094_v36, %v2070_v54  ;;  %v2111_v43 = vshrl.u32 %v2069_v24, 16  ;;  %v2112_v40 = vshrl.u32 %v2093_v41, 16 }
 0x324   : > { %v2437_v45 = vpack.i.b16 %v4674_v39, %v4671_v16  ;;  %v2757_v61 = vshrl.u32 %v4665_v31, 16  ;;  %v2107_v34 = vpack.i.b16 %v2106_v11, %v2105_v23  ;;  %v2758_v46 = vshrl.u32 %v4668_v8, 16 }
 0x325   : > { %v2712_v51 = vcombine.high %v2711_v49, %v5240_v3  ;;  %v2737_v4 = vcombine.high %v2736_v55, %v5240_v3  ;;  %v2727_v58 = vcombine.high %v4665_v31, %v5240_v3  ;;  %v2752_v14 = vcombine.high %v4668_v8, %v5240_v3 }
 0x326   : > { %2914 = vrot.lane.b32.xlu0 %v2702_v0, %s3619_s17  ;;  %2916 = vrot.lane.b32.xlu1 %v2703_v5, %s3619_s17  ;;  %v2113_v47 = vpack.i.b16 %v2112_v40, %v2111_v43  ;;  %v2759_v57 = vpack.i.b16 %v2758_v46, %v2757_v61  ;;  %v2071_v18 = vcombine.high %v2069_v24, %v5240_v3  ;;  %v2438_v55 = vshrl.u32 %v4671_v16, 16 }
 0x327   : > { %v2726_v30 = vrot.slane %v2712_v51, %v3857_v50  ;;  %v2751_v35 = vrot.slane %v2737_v4, %v3857_v50  ;;  %v2763_v22 = vshrl.u32 %v2727_v58, 16  ;;  %v2764_v13 = vshrl.u32 %v2752_v14, 16 }
 0x328   : > { %v2762_v9 = vpack.i.b16 %v2752_v14, %v2727_v58  ;;  %v2095_v21 = vcombine.high %v2093_v41, %v5240_v3  ;;  %v2117_v33 = vshrl.u32 %v2071_v18, 16  ;;  %v2393_v7 = vcombine.high %v2392_v42, %v5240_v3 }
 0x329   : > { %v2768_v25 = vpack.i.b16 %v2751_v35, %v2726_v30  ;;  %v2765_v62 = vpack.i.b16 %v2764_v13, %v2763_v22  ;;  %v2418_v15 = vcombine.high %v2417_v28, %v5240_v3  ;;  %v2728_v5 = vcombine.high %v2726_v30, %v5240_v3 }
 0x32a   : > { %2488 = vrot.lane.b32.xlu0 %v2377_v60, %s5268_s10  ;;  %2490 = vrot.lane.b32.xlu1 %v2384_v52, %s5268_s10  ;;  %v2116_v10 = vpack.i.b16 %v2095_v21, %v2071_v18  ;;  %v2118_v0 = vshrl.u32 %v2095_v21, 16  ;;  %v2753_v29 = vcombine.high %v2751_v35, %v5240_v3  ;;  %v2769_v59 = vshrl.u32 %v2726_v30, 16 }
 0x32b   : > { %v2770_v6 = vshrl.u32 %v2751_v35, 16  ;;  %v2407_v2 = vrot.slane %v2393_v7, %v3857_v50  ;;  %v2432_v48 = vrot.slane %v2418_v15, %v3857_v50  ;;  %v2775_v17 = vshrl.u32 %v2728_v5, 16 }
 0x32c   : > { %v2119_v53 = vpack.i.b16 %v2118_v0, %v2117_v33  ;;  %v2776_v49 = vshrl.u32 %v2753_v29, 16  ;;  %v2439_v42 = vshrl.u32 %v4674_v39, 16  ;;  %v2408_v28 = vcombine.high %v4671_v16, %v5240_v3 }
 0x32d   : > { %v2449_v32 = vpack.i.b16 %v2432_v48, %v2407_v2  ;;  %v2433_v27 = vcombine.high %v4674_v39, %v5240_v3  ;;  %v2450_v36 = vshrl.u32 %v2407_v2, 16  ;;  %v2409_v11 = vcombine.high %v2407_v2, %v5240_v3 }
 0x32e   : > { %2595 = vrot.lane.b32.xlu0 %v2377_v60, %s3619_s17  ;;  %2597 = vrot.lane.b32.xlu1 %v2384_v52, %s3619_s17  ;;  %v2774_v60 = vpack.i.b16 %v2753_v29, %v2728_v5  ;;  %v2771_v52 = vpack.i.b16 %v2770_v6, %v2769_v59  ;;  %v2440_v37 = vpack.i.b16 %v2439_v42, %v2438_v55  ;;  %v2444_v41 = vshrl.u32 %v2408_v28, 16 }
 0x32f   : > { %v2777_v24 = vpack.i.b16 %v2776_v49, %v2775_v17  ;;  %v2445_v54 = vshrl.u32 %v2433_v27, 16  ;;  %v2456_v61 = vshrl.u32 %v2409_v11, 16 }
 0x331   : > { %v2446_v23 = vpack.i.b16 %v2445_v54, %v2444_v41 }
 0x332   : > { %2120 = vrot.lane.b32.xlu1 %v2101_v38, %s5269_s18  ;;  %2126 = vrot.lane.b32.xlu0 %v2110_v1, %s3640_s20  ;;  %v2451_v38 = vshrl.u32 %v2432_v48, 16  ;;  %v2443_v1 = vpack.i.b16 %v2433_v27, %v2408_v28 }
 0x334   : > { %v2452_v43 = vpack.i.b16 %v2451_v38, %v2450_v36 }
 0x336   : > { %2122 = vrot.lane.b32.xlu1 %v2104_v44, %s3641_s16  ;;  %2124 = vrot.lane.b32.xlu0 %v2107_v34, %s3642_s9  ;;  %v2434_v44 = vcombine.high %v2432_v48, %v5240_v3 }
 0x338   : > { %v2455_v40 = vpack.i.b16 %v2434_v44, %v2409_v11  ;;  %v2457_v34 = vshrl.u32 %v2434_v44, 16 }
 0x33a   : > { %2128 = vrot.lane.b32.xlu1 %v2113_v47, %s5227_s21  ;;  %2778 = vrot.lane.b32.xlu0 %v2759_v57, %s5269_s18  ;;  %v2458_v46 = vpack.i.b16 %v2457_v34, %v2456_v61 }
 0x33e   : > { %2780 = vrot.lane.b32.xlu1 %v2762_v9, %s3641_s16  ;;  %2784 = vrot.lane.b32.xlu0 %v2768_v25, %s3640_s20 }
 0x342   : > { %2782 = vrot.lane.b32.xlu0 %v2765_v62, %s3642_s9  ;;  %2130 = vrot.lane.b32.xlu1 %v2116_v10, %s5229_s22 }
 0x346   : > { %2132 = vrot.lane.b32.xlu0 %v2119_v53, %s5228_s23  ;;  %2788 = vrot.lane.b32.xlu1 %v2774_v60, %s5229_s22 }
 0x34a   : > { %2786 = vrot.lane.b32.xlu0 %v2771_v52, %s5227_s21  ;;  %2465 = vrot.lane.b32.xlu1 %v2449_v32, %s3640_s20 }
 0x34e   : > { %2459 = vrot.lane.b32.xlu0 %v2440_v37, %s5269_s18  ;;  %2790 = vrot.lane.b32.xlu1 %v2777_v24, %s5228_s23 }
 0x352   : > { %2461 = vrot.lane.b32.xlu0 %v2443_v1, %s3641_s16  ;;  %2463 = vrot.lane.b32.xlu1 %v2446_v23, %s3642_s9 }
 0x356   : > { %2467 = vrot.lane.b32.xlu0 %v2452_v43, %s5227_s21  ;;  %2469 = vrot.lane.b32.xlu1 %v2455_v40, %s5229_s22 }
 0x35a   : > { %2471 = vrot.lane.b32.xlu1 %v2458_v46, %s5228_s23 }
 0x38c   : > { %v2158_v51 = vpop.permute.xlu0 %2157  ;;  %v2160_v4 = vpop.permute.xlu1 %2159 }
 0x38d   : > { %v2168_v58 = vrot.slane %v2158_v51, %v5267_v63  ;;  %v2193_v14 = vrot.slane %v2160_v4, %v5267_v63 }
 0x38f   : > { %v4734_v47 = vrot.slane %v2168_v58, %v3857_v50  ;;  %v4737_v57 = vrot.slane %v2193_v14, %v3857_v50  ;;  %v2169_v29 = vcombine.high %v2168_v58, %v5240_v3  ;;  %v2194_v59 = vcombine.high %v2193_v14, %v5240_v3 }
 0x390   : > { %v2265_v30 = vpop.permute.xlu0 %2264  ;;  %v2267_v35 = vpop.permute.xlu1 %2266 }
 0x391   : > { %v2214_v22 = vshrl.u32 %v4734_v47, 16  ;;  %v2215_v13 = vshrl.u32 %v4737_v57, 16  ;;  %v2275_v18 = vrot.slane %v2265_v30, %v5267_v63  ;;  %v2300_v9 = vrot.slane %v2267_v35, %v5267_v63 }
 0x392   : > { %v2184_v15 = vcombine.high %v4734_v47, %v5240_v3  ;;  %v2209_v10 = vcombine.high %v4737_v57, %v5240_v3  ;;  %v2183_v17 = vrot.slane %v2169_v29, %v3857_v50  ;;  %v2208_v49 = vrot.slane %v2194_v59, %v3857_v50 }
 0x393   : > { %v4744_v62 = vrot.slane %v2275_v18, %v3857_v50  ;;  %v4747_v33 = vrot.slane %v2300_v9, %v3857_v50  ;;  %v2216_v7 = vpack.i.b16 %v2215_v13, %v2214_v22  ;;  %v2276_v28 = vcombine.high %v2275_v18, %v5240_v3 }
 0x394   : > { %v2808_v25 = vpop.permute.xlu0 %2807  ;;  %v2810_v21 = vpop.permute.xlu1 %2809  ;;  %v2219_v60 = vpack.i.b16 %v2209_v10, %v2184_v15  ;;  %v2301_v27 = vcombine.high %v2300_v9, %v5240_v3  ;;  %v2225_v36 = vpack.i.b16 %v2208_v49, %v2183_v17  ;;  %v2226_v44 = vshrl.u32 %v2183_v17, 16 }
 0x395   : > { %2235 = vrot.lane.b32.xlu0 %v2216_v7, %s5269_s18  ;;  %v2321_v6 = vshrl.u32 %v4744_v62, 16  ;;  %v2322_v2 = vshrl.u32 %v4747_v33, 16  ;;  %v2291_v48 = vcombine.high %v4744_v62, %v5240_v3  ;;  %v2316_v53 = vcombine.high %v4747_v33, %v5240_v3 }
 0x396   : > { %2237 = vrot.lane.b32.xlu1 %v2219_v60, %s3641_s16  ;;  %v2290_v38 = vrot.slane %v2276_v28, %v3857_v50  ;;  %v2315_v1 = vrot.slane %v2301_v27, %v3857_v50  ;;  %v2227_v43 = vshrl.u32 %v2208_v49, 16  ;;  %v2818_v61 = vrot.slane %v2808_v25, %v5267_v63 }
 0x397   : > { %v2323_v55 = vpack.i.b16 %v2322_v2, %v2321_v6  ;;  %v2326_v42 = vpack.i.b16 %v2316_v53, %v2291_v48  ;;  %v2327_v41 = vshrl.u32 %v2291_v48, 16  ;;  %v2328_v54 = vshrl.u32 %v2316_v53, 16 }
 0x398   : > { %v2915_v0 = vpop.permute.xlu0 %2914  ;;  %v2917_v5 = vpop.permute.xlu1 %2916  ;;  %v2843_v34 = vrot.slane %v2810_v21, %v5267_v63  ;;  %v2220_v46 = vshrl.u32 %v2184_v15, 16  ;;  %v2221_v51 = vshrl.u32 %v2209_v10, 16  ;;  %v2332_v4 = vpack.i.b16 %v2315_v1, %v2290_v38 }
 0x399   : > { %2342 = vrot.lane.b32.xlu0 %v2323_v55, %s5269_s18  ;;  %v2329_v40 = vpack.i.b16 %v2328_v54, %v2327_v41  ;;  %v4784_v30 = vcombine.high %v2183_v17, %v5240_v3  ;;  %v4787_v35 = vcombine.high %v2208_v49, %v5240_v3  ;;  %v2228_v22 = vpack.i.b16 %v2227_v43, %v2226_v44 }
 0x39a   : > { %2344 = vrot.lane.b32.xlu1 %v2326_v42, %s3641_s16  ;;  %v2333_v18 = vshrl.u32 %v2290_v38, 16  ;;  %v2334_v9 = vshrl.u32 %v2315_v1, 16  ;;  %v4795_v25 = vrot.slane %v2818_v61, %v3857_v50  ;;  %v4798_v21 = vrot.slane %v2843_v34, %v3857_v50 }
 0x39b   : > { %v4803_v56 = vrot.slane %v2915_v0, %v5267_v63  ;;  %v4806_v12 = vrot.slane %v2917_v5, %v5267_v63  ;;  %v4810_v59 = vcombine.high %v2290_v38, %v5240_v3  ;;  %v4813_v6 = vcombine.high %v2315_v1, %v5240_v3 }
 0x39c   : > { %v4762_v52 = vpop.permute.xlu0 %2488  ;;  %v4764_v32 = vpop.permute.xlu1 %2490  ;;  %v2231_v2 = vpack.i.b16 %v4787_v35, %v4784_v30  ;;  %v2819_v48 = vcombine.high %v2818_v61, %v5240_v3  ;;  %v4826_v53 = vcombine.high %v4795_v25, %v5240_v3  ;;  %v2864_v60 = vshrl.u32 %v4795_v25, 16 }
 0x39d   : > { %2241 = vrot.lane.b32.xlu0 %v2225_v36, %s3640_s20  ;;  %v2865_v49 = vshrl.u32 %v4798_v21, 16  ;;  %v4834_v55 = vrot.slane %v4803_v56, %v3857_v50  ;;  %v4838_v31 = vrot.slane %v4806_v12, %v3857_v50  ;;  %v2335_v8 = vpack.i.b16 %v2334_v9, %v2333_v18 }
 0x39e   : > { %2346 = vrot.lane.b32.xlu1 %v2329_v40, %s3642_s9  ;;  %v2844_v28 = vcombine.high %v2843_v34, %v5240_v3  ;;  %v4843_v27 = vcombine.high %v4798_v21, %v5240_v3  ;;  %v2338_v41 = vpack.i.b16 %v4813_v6, %v4810_v59  ;;  %v4850_v36 = vrot.slane %v2819_v48, %v3857_v50 }
 0x39f   : > { %v4854_v38 = vrot.slane %v4762_v52, %v5267_v63  ;;  %v4858_v1 = vrot.slane %v4764_v32, %v5267_v63  ;;  %v2972_v44 = vshrl.u32 %v4838_v31, 16  ;;  %v2866_v52 = vpack.i.b16 %v2865_v49, %v2864_v60 }
 0x3a0   : > { %v4772_v37 = vpop.permute.xlu0 %2595  ;;  %v4774_v24 = vpop.permute.xlu1 %2597  ;;  %v2858_v32 = vrot.slane %v2844_v28, %v3857_v50  ;;  %v2869_v34 = vpack.i.b16 %v4843_v27, %v4826_v53  ;;  %v2233_v18 = vshrl.u32 %v4787_v35, 16  ;;  %v2320_v35 = vpack.i.b16 %v4747_v33, %v4744_v62 }
 0x3a1   : > { %2348 = vrot.lane.b32.xlu0 %v2332_v4, %s3640_s20  ;;  %v4869_v43 = vrot.slane %v4774_v24, %v5267_v63  ;;  %v4880_v24 = vrot.slane %v4854_v38, %v3857_v50  ;;  %v4884_v4 = vrot.slane %v4858_v1, %v3857_v50  ;;  %v2339_v60 = vshrl.u32 %v4810_v59, 16 }
 0x3a2   : > { %2243 = vrot.lane.b32.xlu1 %v2228_v22, %s5227_s21  ;;  %v2871_v28 = vshrl.u32 %v4843_v27, 16 }
 0x3a3   : > { %v2546_v27 = vshrl.u32 %v4884_v4, 16 }
 0x3a4   : > { %v2121_v23 = vpop.permute.xlu1 %2120  ;;  %v2127_v11 = vpop.permute.xlu0 %2126 }
 0x3a5   : > { %v2136_v13 = vsel %vm460_vm6, %v2098_v19, %v2121_v23  ;;  %v2222_v19 = vpack.i.b16 %v2221_v51, %v2220_v46  ;;  %v4862_v23 = vrot.slane %v4772_v37, %v5267_v63 }
 0x3a6   : > { %2245 = vrot.lane.b32.xlu1 %v2231_v2, %s5229_s22  ;;  %v2863_v2 = vpack.i.b16 %v4798_v21, %v4795_v25 }
 0x3a7   : > { %2239 = vrot.lane.b32.xlu0 %v2222_v19, %s3642_s9  ;;  %v4899_v19 = vcombine.high %v4834_v55, %v5240_v3 }
 0x3a8   : > { %v2123_v58 = vpop.permute.xlu1 %2122  ;;  %v2125_v14 = vpop.permute.xlu0 %2124 }
 0x3a9   : > { %v2139_v7 = vsel %vm2137_vm14, %v2136_v13, %v2123_v58  ;;  %v4888_v58 = vrot.slane %v4862_v23, %v3857_v50  ;;  %v2232_v13 = vshrl.u32 %v4784_v30, 16  ;;  %v2213_v30 = vpack.i.b16 %v4737_v57, %v4734_v47 }
 0x3aa   : > { %v2142_v15 = vsel %vm2140_vm15, %v2139_v7, %v2125_v14  ;;  %2352 = vrot.lane.b32.xlu1 %v2338_v41, %s5229_s22  ;;  %v4893_v14 = vrot.slane %v4869_v43, %v3857_v50 }
 0x3ab   : > { %v2145_v0 = vsel %vm2143_vm1, %v2142_v15, %v2127_v11  ;;  %2350 = vrot.lane.b32.xlu0 %v2335_v8, %s5227_s21  ;;  %v2971_v11 = vshrl.u32 %v4834_v55, 16  ;;  %v4903_v15 = vcombine.high %v4838_v31, %v5240_v3  ;;  %v2234_v48 = vpack.i.b16 %v2233_v18, %v2232_v13 }
 0x3ac   : > { %v2129_v10 = vpop.permute.xlu1 %2128  ;;  %v2779_v29 = vpop.permute.xlu0 %2778  ;;  %v2653_v16 = vshrl.u32 %v4893_v14, 16 }
 0x3ad   : > { %v2794_v5 = vsel %vm460_vm6, %v2756_v20, %v2779_v29  ;;  %v2148_v17 = vsel %vm2146_vm2, %v2145_v0, %v2129_v10  ;;  %v2973_v22 = vpack.i.b16 %v2972_v44, %v2971_v11  ;;  %v2875_v10 = vpack.i.b16 %v2858_v32, %v4850_v36 }
 0x3ae   : > { %2887 = vrot.lane.b32.xlu1 %v2869_v34, %s3641_s16  ;;  %v2970_v0 = vpack.i.b16 %v4838_v31, %v4834_v55  ;;  %v2976_v41 = vpack.i.b16 %v4903_v15, %v4899_v19  ;;  %v2877_v11 = vshrl.u32 %v2858_v32, 16  ;;  %v2545_v44 = vshrl.u32 %v4880_v24, 16 }
 0x3af   : > { %2885 = vrot.lane.b32.xlu0 %v2866_v52, %s5269_s18 }
 0x3b0   : > { %v2781_v20 = vpop.permute.xlu1 %2780  ;;  %v2785_v42 = vpop.permute.xlu0 %2784  ;;  %v2547_v39 = vpack.i.b16 %v2546_v27, %v2545_v44  ;;  %v2632_v44 = vcombine.high %v4869_v43, %v5240_v3 }
 0x3b1   : > { %v2796_v54 = vsel %vm2137_vm14, %v2794_v5, %v2781_v20  ;;  %v2544_v5 = vpack.i.b16 %v4884_v4, %v4880_v24  ;;  %v2651_v20 = vpack.i.b16 %v4893_v14, %v4888_v58 }
 0x3b2   : > { %2891 = vrot.lane.b32.xlu1 %v2875_v10, %s3640_s20  ;;  %v2977_v10 = vshrl.u32 %v4899_v19, 16  ;;  %v2647_v19 = vcombine.high %v4893_v14, %v5240_v3 }
 0x3b3   : > { %2992 = vrot.lane.b32.xlu0 %v2973_v22, %s5269_s18 }
 0x3b4   : > { %v2783_v40 = vpop.permute.xlu0 %2782  ;;  %v2131_v61 = vpop.permute.xlu1 %2130 }
 0x3b5   : > { %v2798_v37 = vsel %vm2140_vm15, %v2796_v54, %v2783_v40  ;;  %v2151_v46 = vsel %vm2149_vm3, %v2148_v17, %v2131_v61  ;;  %v2340_v17 = vshrl.u32 %v4813_v6, 16  ;;  %v2876_v6 = vshrl.u32 %v4850_v36, 16 }
 0x3b6   : > { %v2800_v51 = vsel %vm2143_vm1, %v2798_v37, %v2785_v42  ;;  %v2870_v42 = vshrl.u32 %v4826_v53, 16  ;;  %2994 = vrot.lane.b32.xlu1 %v2976_v41, %s3641_s16 }
 0x3b7   : > { %2247 = vrot.lane.b32.xlu0 %v2234_v48, %s5228_s23  ;;  %v2341_v52 = vpack.i.b16 %v2340_v17, %v2339_v60  ;;  %v2878_v22 = vpack.i.b16 %v2877_v11, %v2876_v6  ;;  %v2500_v48 = vcombine.high %v4854_v38, %v5240_v3  ;;  %v2525_v60 = vcombine.high %v4858_v1, %v5240_v3 }
 0x3b8   : > { %v2133_v9 = vpop.permute.xlu0 %2132  ;;  %v2789_v7 = vpop.permute.xlu1 %2788  ;;  %v2872_v61 = vpack.i.b16 %v2871_v28, %v2870_v42  ;;  %v2622_v28 = vcombine.high %v4888_v58, %v5240_v3  ;;  %v2515_v1 = vcombine.high %v4880_v24, %v5240_v3  ;;  %v2607_v11 = vcombine.high %v4862_v23, %v5240_v3 }
 0x3b9   : > { %v4907_v29 = vsel %vm2152_vm4, %v2151_v46, %v2133_v9  ;;  %v2835_v46 = vcombine.high %v4850_v36, %v5240_v3  ;;  %v2652_v9 = vshrl.u32 %v4888_v58, 16  ;;  %v2514_v38 = vrot.slane %v2500_v48, %v3857_v50 }
 0x3ba   : > { %2889 = vrot.lane.b32.xlu1 %v2872_v61, %s3642_s9  ;;  %v2539_v6 = vrot.slane %v2525_v60, %v3857_v50  ;;  %v2621_v61 = vrot.slane %v2607_v11, %v3857_v50  ;;  %v2658_v23 = vshrl.u32 %v2622_v28, 16  ;;  %v2926_v48 = vcombine.high %v4803_v56, %v5240_v3 }
 0x3bb   : > { %2354 = vrot.lane.b32.xlu0 %v2341_v52, %s5228_s23  ;;  %v2654_v41 = vpack.i.b16 %v2653_v16, %v2652_v9  ;;  %v2657_v52 = vpack.i.b16 %v2647_v19, %v2622_v28  ;;  %v2882_v9 = vshrl.u32 %v2835_v46, 16 }
 0x3bc   : > { %v2787_v49 = vpop.permute.xlu0 %2786  ;;  %v2466_v8 = vpop.permute.xlu1 %2465 }
 0x3bd   : > { %v2802_v54 = vsel %vm2146_vm2, %v2800_v51, %v2787_v49  ;;  %v2860_v51 = vcombine.high %v2858_v32, %v5240_v3  ;;  %v2978_v32 = vshrl.u32 %v4903_v15, 16 }
 0x3be   : > { %v2804_v59 = vsel %vm2149_vm3, %v2802_v54, %v2789_v7  ;;  %2566 = vrot.lane.b32.xlu1 %v2547_v39, %s5269_s18  ;;  %v2540_v54 = vcombine.high %v4884_v4, %v5240_v3  ;;  %v2557_v39 = vshrl.u32 %v2514_v38, 16 }
 0x3bf   : > { %2893 = vrot.lane.b32.xlu0 %v2878_v22, %s5227_s21  ;;  %v2881_v17 = vpack.i.b16 %v2860_v51, %v2835_v46  ;;  %v2556_v22 = vpack.i.b16 %v2539_v6, %v2514_v38  ;;  %v2883_v16 = vshrl.u32 %v2860_v51, 16  ;;  %v2516_v46 = vcombine.high %v2514_v38, %v5240_v3 }
 0x3c0   : > { %v2460_v53 = vpop.permute.xlu0 %2459  ;;  %v2791_v40 = vpop.permute.xlu1 %2790  ;;  %v2550_v27 = vpack.i.b16 %v2540_v54, %v2515_v1  ;;  %v2541_v51 = vcombine.high %v2539_v6, %v5240_v3 }
 0x3c1   : > { %v2475_v34 = vsel %vm460_vm6, %v2437_v45, %v2460_v53  ;;  %v4941_v37 = vsel %vm2152_vm4, %v2804_v59, %v2791_v40  ;;  %v2979_v59 = vpack.i.b16 %v2978_v32, %v2977_v10  ;;  %v2551_v53 = vshrl.u32 %v2515_v1, 16 }
 0x3c2   : > { %2673 = vrot.lane.b32.xlu1 %v2654_v41, %s5269_s18  ;;  %v2552_v40 = vshrl.u32 %v2540_v54, 16  ;;  %v2664_v10 = vshrl.u32 %v2621_v61, 16  ;;  %v2884_v32 = vpack.i.b16 %v2883_v16, %v2882_v9  ;;  %v2563_v56 = vshrl.u32 %v2516_v46, 16 }
 0x3c3   : > { %2895 = vrot.lane.b32.xlu0 %v2881_v17, %s5229_s22  ;;  %v2951_v17 = vcombine.high %v4806_v12, %v5240_v3  ;;  %v2564_v41 = vshrl.u32 %v2541_v51, 16 }
 0x3c4   : > { %v2462_v13 = vpop.permute.xlu0 %2461  ;;  %v2464_v18 = vpop.permute.xlu1 %2463  ;;  %v2553_v43 = vpack.i.b16 %v2552_v40, %v2551_v53  ;;  %v3514_v40 = vld [vmem:[%s3769_s13 + $0x8] sm:$0xf] }
 0x3c5   : > { %v2477_v45 = vsel %vm2137_vm14, %v2475_v34, %v2462_v13  ;;  %v2646_v34 = vrot.slane %v2632_v44, %v3857_v50  ;;  %v2659_v13 = vshrl.u32 %v2647_v19, 16  ;;  %v2562_v19 = vpack.i.b16 %v2541_v51, %v2516_v46 }
 0x3c6   : > { %v2479_v7 = vsel %vm2140_vm15, %v2477_v45, %v2464_v18  ;;  %2675 = vrot.lane.b32.xlu1 %v2657_v52, %s3641_s16  ;;  %v2558_v45 = vshrl.u32 %v2539_v6, 16  ;;  %v2965_v38 = vrot.slane %v2951_v17, %v3857_v50  ;;  %v2565_v12 = vpack.i.b16 %v2564_v41, %v2563_v56  ;;  %v3513_v52 = vld [vmem:[%s3769_s13] sm:$0xff] }
 0x3c7   : > { %v2481_v36 = vsel %vm2143_vm1, %v2479_v7, %v2466_v8  ;;  %2996 = vrot.lane.b32.xlu0 %v2979_v59, %s3642_s9  ;;  %v2663_v18 = vpack.i.b16 %v2646_v34, %v2621_v61  ;;  %v2660_v7 = vpack.i.b16 %v2659_v13, %v2658_v23  ;;  %v3129_v53 = vrot.slane %v3513_v52, 2  ;;  %v3515_v13 = vld [vmem:[%s3769_s13 + $0x30] sm:$0xff]  ;;  %v3107_v56 = vld [vmem:[%s5204_s6] sm:$0xf] }
 0x3c8   : > { %v2468_v49 = vpop.permute.xlu0 %2467  ;;  %v2470_v42 = vpop.permute.xlu1 %2469  ;;  %v2559_v60 = vpack.i.b16 %v2558_v45, %v2557_v39  ;;  %v2967_v11 = vcombine.high %v2965_v38, %v5240_v3  ;;  %v3516_v39 = vld [vmem:[%s3769_s13 + $0x38] sm:$0xf] }
 0x3c9   : > { %v2483_v8 = vsel %vm2146_vm2, %v2481_v36, %v2468_v49  ;;  %v2665_v36 = vshrl.u32 %v2646_v34, 16  ;;  %v2623_v49 = vcombine.high %v2621_v61, %v5240_v3  ;;  %v3136_v45 = vrot.slane %v3516_v39, 2 }
 0x3ca   : > { %v4968_v15 = vsel %vm2149_vm3, %v2483_v8, %v2470_v42  ;;  %2572 = vrot.lane.b32.xlu1 %v2556_v22, %s3640_s20  ;;  %v2648_v42 = vcombine.high %v2646_v34, %v5240_v3  ;;  %v2940_v8 = vrot.slane %v2926_v48, %v3857_v50  ;;  %v2984_v34 = vshrl.u32 %v2965_v38, 16 }
 0x3cb   : > { %2568 = vrot.lane.b32.xlu0 %v2550_v27, %s3641_s16  ;;  %v2666_v28 = vpack.i.b16 %v2665_v36, %v2664_v10  ;;  %v2670_v54 = vshrl.u32 %v2623_v49, 16  ;;  %v3130_v27 = vrot.slane %v3514_v40, 2  ;;  %v2990_v16 = vshrl.u32 %v2967_v11, 16  ;;  %v3518_v36 = vld [vmem:[%s3769_s13 + $0x20] sm:$0xf] }
 0x3cc   : > { %v2669_v1 = vpack.i.b16 %v2648_v42, %v2623_v49  ;;  %v2671_v59 = vshrl.u32 %v2648_v42, 16  ;;  %v2942_v6 = vcombine.high %v2940_v8, %v5240_v3  ;;  %v2982_v44 = vpack.i.b16 %v2965_v38, %v2940_v8  ;;  %v3520_v49 = vld [vmem:[%s3769_s13 + $0x50] sm:$0xf] }
 0x3cd   : > { %v2983_v61 = vshrl.u32 %v2940_v8, 16  ;;  %v3131_v3 = vsel %vm1824_vm11, %v3129_v53, %v3130_v27  ;;  %v3139_v42 = vrot.slane %v3520_v49, 2  ;;  %v2472_v8 = vpop.permute.xlu1 %2471 }
 0x3ce   : > { %2679 = vrot.lane.b32.xlu1 %v2663_v18, %s3640_s20  ;;  %v2672_v22 = vpack.i.b16 %v2671_v59, %v2670_v54  ;;  %v2988_v23 = vpack.i.b16 %v2967_v11, %v2942_v6  ;;  %v2989_v9 = vshrl.u32 %v2942_v6, 16 }
 0x3cf   : > { %2570 = vrot.lane.b32.xlu0 %v2553_v43, %s3642_s9  ;;  %v3135_v43 = vrot.slane %v3515_v13, 2  ;;  %v2985_v18 = vpack.i.b16 %v2984_v34, %v2983_v61 }
 0x3d0   : > { %v2991_v48 = vpack.i.b16 %v2990_v16, %v2989_v9 }
 0x3d1   : > { %v3137_v46 = vsel %vm1824_vm11, %v3135_v43, %v3136_v45 }
 0x3d2   : > { %2897 = vrot.lane.b32.xlu1 %v2884_v32, %s5228_s23  ;;  %v3133_v32 = vrot.slane %v3518_v36, 2 }
 0x3d3   : > { %2677 = vrot.lane.b32.xlu0 %v2660_v7, %s3642_s9  ;;  %v3517_v7 = vld [vmem:[%s3769_s13 + $0x18] sm:$0xff] }
 0x3d4   : > { %v3132_v10 = vrot.slane %v3517_v7, 2  ;;  %v2487_v7 = vsel %vm2152_vm4, %v4968_v15, %v2472_v8 }
 0x3d6   : > { %2681 = vrot.lane.b32.xlu1 %v2666_v28, %s5227_s21  ;;  %v3134_v51 = vsel %vm1824_vm11, %v3132_v10, %v3133_v32  ;;  %v3100_v28 = vld [vmem:[%s5203_s5] sm:$0xf] }
 0x3d7   : > { %2574 = vrot.lane.b32.xlu0 %v2559_v60, %s5227_s21  ;;  %v3519_v60 = vld [vmem:[%s3769_s13 + $0x48] sm:$0xff] }
 0x3d8   : > { %v3138_v17 = vrot.slane %v3519_v60, 2  ;;  %v3026_v60 = vrot.slane %v2487_v7, 5 }
 0x3da   : > { %2683 = vrot.lane.b32.xlu1 %v2669_v1, %s5229_s22 }
 0x3db   : > { %2576 = vrot.lane.b32.xlu0 %v2562_v19, %s5229_s22  ;;  %v3140_v19 = vsel %vm1824_vm11, %v3138_v17, %v3139_v42 }
 0x3de   : > { %2998 = vrot.lane.b32.xlu1 %v2982_v44, %s3640_s20 }
 0x3df   : > { %2578 = vrot.lane.b32.xlu0 %v2565_v12, %s5228_s23 }
 0x3e2   : > { %3002 = vrot.lane.b32.xlu1 %v2988_v23, %s5229_s22 }
 0x3e3   : > { %2685 = vrot.lane.b32.xlu0 %v2672_v22, %s5228_s23 }
 0x3e6   : > { %3141 = vrot.lane.b32.xlu1 %v3131_v3, %s3619_s17 }
 0x3e7   : > { %3000 = vrot.lane.b32.xlu0 %v2985_v18, %s5227_s21  ;;  %s5271_s21 = smov 80  }
 0x3ea   : > { %3145 = vrot.lane.b32.xlu1 %v3137_v46, %s3619_s17 }
 0x3eb   : > { %3004 = vrot.lane.b32.xlu0 %v2991_v48, %s5228_s23  ;;  %s5270_s23 = smov 96  }
 0x3ee   : > { %3103 = vperm.xlu1 %3499, %v3100_v28  }
 0x3ef   : > { %3143 = vrot.lane.b32.xlu0 %v3134_v51, %s3619_s17 }
 0x3f3   : > { %3147 = vrot.lane.b32.xlu0 %v3140_v19, %s3619_s17 }
 0x3f7   : > { %3110 = vperm.xlu0 %3500, %v3107_v56  }
 0x407   : > { %v2236_v41 = vpop.permute.xlu0 %2235 }
 0x408   : > { %v2251_v38 = vsel %vm460_vm6, %v2213_v30, %v2236_v41  ;;  %v2238_v1 = vpop.permute.xlu1 %2237 }
 0x409   : > { %v2253_v61 = vsel %vm2137_vm14, %v2251_v38, %v2238_v1 }
 0x40b   : > { %v2343_v12 = vpop.permute.xlu0 %2342 }
 0x40c   : > { %v2345_v54 = vpop.permute.xlu1 %2344  ;;  %v2358_v57 = vsel %vm460_vm6, %v2320_v35, %v2343_v12 }
 0x40d   : > { %v2360_v43 = vsel %vm2137_vm14, %v2358_v57, %v2345_v54 }
 0x40f   : > { %v2242_v59 = vpop.permute.xlu0 %2241 }
 0x410   : > { %v2347_v6 = vpop.permute.xlu1 %2346 }
 0x411   : > { %v2362_v18 = vsel %vm2140_vm15, %v2360_v43, %v2347_v6 }
 0x413   : > { %v2349_v11 = vpop.permute.xlu0 %2348 }
 0x414   : > { %v2244_v44 = vpop.permute.xlu1 %2243  ;;  %v2364_v9 = vsel %vm2143_vm1, %v2362_v18, %v2349_v11 }
 0x418   : > { %v2246_v53 = vpop.permute.xlu1 %2245 }
 0x419   : > { %v2240_v52 = vpop.permute.xlu0 %2239 }
 0x41a   : > { %v2255_v34 = vsel %vm2140_vm15, %v2253_v61, %v2240_v52 }
 0x41b   : > { %v2257_v47 = vsel %vm2143_vm1, %v2255_v34, %v2242_v59 }
 0x41c   : > { %v2353_v27 = vpop.permute.xlu1 %2352  ;;  %v2259_v3 = vsel %vm2146_vm2, %v2257_v47, %v2244_v44 }
 0x41d   : > { %v2351_v40 = vpop.permute.xlu0 %2350  ;;  %v2261_v16 = vsel %vm2149_vm3, %v2259_v3, %v2246_v53 }
 0x41e   : > { %v2366_v45 = vsel %vm2146_vm2, %v2364_v9, %v2351_v40 }
 0x41f   : > { %v2368_v10 = vsel %vm2149_vm3, %v2366_v45, %v2353_v27 }
 0x420   : > { %v2888_v23 = vpop.permute.xlu1 %2887 }
 0x421   : > { %v2886_v22 = vpop.permute.xlu0 %2885 }
 0x422   : > { %v2901_v52 = vsel %vm460_vm6, %v2863_v2, %v2886_v22 }
 0x423   : > { %v2903_v24 = vsel %vm2137_vm14, %v2901_v52, %v2888_v23 }
 0x424   : > { %v2892_v13 = vpop.permute.xlu1 %2891 }
 0x425   : > { %v5047_v30 = vpop.permute.xlu0 %2992 }
 0x428   : > { %v2995_v33 = vpop.permute.xlu1 %2994 }
 0x429   : > { %v2248_v39 = vpop.permute.xlu0 %2247 }
 0x42a   : > { %v2263_v62 = vsel %vm2152_vm4, %v2261_v16, %v2248_v39 }
 0x42b   : > { %v3022_v35 = vrot.slane %v2263_v62, 7 }
 0x42c   : > { %v2890_v46 = vpop.permute.xlu1 %2889 }
 0x42d   : > { %v3037_v36 = vsel %vm3035_vm7, %v4907_v29, %v3022_v35  ;;  %v2355_v32 = vpop.permute.xlu0 %2354  ;;  %v2905_v34 = vsel %vm2140_vm15, %v2903_v24, %v2890_v46 }
 0x42e   : > { %v2370_v48 = vsel %vm2152_vm4, %v2368_v10, %v2355_v32  ;;  %v3032_v10 = vrot.slane %v4941_v37, 2 }
 0x42f   : > { %v3024_v51 = vrot.slane %v2370_v48, 6 }
 0x430   : > { %v2567_v42 = vpop.permute.xlu1 %2566 }
 0x431   : > { %v3039_v17 = vsel %vm1814_vm9, %v3037_v36, %v3024_v51  ;;  %v2894_v49 = vpop.permute.xlu0 %2893  ;;  %v2582_v6 = vsel %vm460_vm6, %v2544_v5, %v2567_v42  ;;  %vm3045_vm9 = vcmask 1044480   ;;  %v3054_v42 = vld [vmem:[%s5202_s4] sm:$0x3] }
 0x432   : > { %v3042_v28 = vsel %vm3040_vm8, %v3039_v17, %v3026_v60 }
 0x434   : > { %v2674_v56 = vpop.permute.xlu1 %2673 }
 0x435   : > { %v2896_v19 = vpop.permute.xlu0 %2895  ;;  %v2689_v27 = vsel %vm460_vm6, %v2651_v20, %v2674_v56  ;;  %v2907_v20 = vsel %vm2143_vm1, %v2905_v34, %v2892_v13  ;;  %v3008_v13 = vsel %vm460_vm6, %v2970_v0, %v5047_v30 }
 0x436   : > { %v2909_v57 = vsel %vm2146_vm2, %v2907_v20, %v2894_v49  ;;  %v3010_v35 = vsel %vm2137_vm14, %v3008_v13, %v2995_v33 }
 0x437   : > { %v2911_v43 = vsel %vm2149_vm3, %v2909_v57, %v2896_v19 }
 0x438   : > { %v2676_v41 = vpop.permute.xlu1 %2675 }
 0x439   : > { %v2997_v15 = vpop.permute.xlu0 %2996  ;;  %v2691_v4 = vsel %vm2137_vm14, %v2689_v27, %v2676_v41 }
 0x43a   : > { %v3012_v36 = vsel %vm2140_vm15, %v3010_v35, %v2997_v15 }
 0x43c   : > { %v2573_v38 = vpop.permute.xlu1 %2572 }
 0x43d   : > { %v2569_v8 = vpop.permute.xlu0 %2568 }
 0x43e   : > { %v2584_v44 = vsel %vm2137_vm14, %v2582_v6, %v2569_v8 }
 0x440   : > { %v2680_v29 = vpop.permute.xlu1 %2679 }
 0x441   : > { %v2571_v1 = vpop.permute.xlu0 %2570 }
 0x442   : > { %v2586_v53 = vsel %vm2140_vm15, %v2584_v44, %v2571_v1 }
 0x443   : > { %v2588_v5 = vsel %vm2143_vm1, %v2586_v53, %v2573_v38 }
 0x444   : > { %v2898_v54 = vpop.permute.xlu1 %2897 }
 0x445   : > { %v2678_v12 = vpop.permute.xlu0 %2677  ;;  %v2913_v39 = vsel %vm2152_vm4, %v2911_v43, %v2898_v54 }
 0x446   : > { %v2693_v25 = vsel %vm2140_vm15, %v2691_v4, %v2678_v12  ;;  %v3034_v32 = vrot.slane %v2913_v39, 1 }
 0x447   : > { %v2695_v23 = vsel %vm2143_vm1, %v2693_v25, %v2680_v29 }
 0x448   : > { %v2682_v11 = vpop.permute.xlu1 %2681 }
 0x449   : > { %v2575_v59 = vpop.permute.xlu0 %2574  ;;  %v2697_v3 = vsel %vm2146_vm2, %v2695_v23, %v2682_v11 }
 0x44a   : > { %v2590_v21 = vsel %vm2146_vm2, %v2588_v5, %v2575_v59 }
 0x44c   : > { %v2684_v61 = vpop.permute.xlu1 %2683 }
 0x44d   : > { %v2577_v40 = vpop.permute.xlu0 %2576  ;;  %v2699_v18 = vsel %vm2149_vm3, %v2697_v3, %v2684_v61 }
 0x44e   : > { %v2592_v2 = vsel %vm2149_vm3, %v2590_v21, %v2577_v40 }
 0x450   : > { %v2999_v14 = vpop.permute.xlu1 %2998 }
 0x451   : > { %v2579_v22 = vpop.permute.xlu0 %2578  ;;  %v3014_v48 = vsel %vm2143_vm1, %v3012_v36, %v2999_v14 }
 0x452   : > { %v2594_v58 = vsel %vm2152_vm4, %v2592_v2, %v2579_v22 }
 0x453   : > { %v3028_v47 = vrot.slane %v2594_v58, 4 }
 0x454   : > { %v3003_v62 = vpop.permute.xlu1 %3002 }
 0x455   : > { %v3044_v9 = vsel %vm1819_vm10, %v3042_v28, %v3028_v47  ;;  %v2686_v16 = vpop.permute.xlu0 %2685  ;;  %vm3050_vm10 = vcmask 1046528  }
 0x456   : > { %v2701_v45 = vsel %vm2152_vm4, %v2699_v18, %v2686_v16 }
 0x457   : > { %v3030_v7 = vrot.slane %v2701_v45, 3 }
 0x458   : > { %v3142_v46 = vpop.permute.xlu1 %3141 }
 0x459   : > { %v3001_v55 = vpop.permute.xlu0 %3000  ;;  %v3047_v31 = vsel %vm3045_vm9, %v3044_v9, %v3030_v7 }
 0x45a   : > { %v3016_v0 = vsel %vm2146_vm2, %v3014_v48, %v3001_v55  ;;  %v3049_v30 = vsel %vm1824_vm11, %v3047_v31, %v3032_v10 }
 0x45b   : > { %v3052_v51 = vsel %vm3050_vm10, %v3049_v30, %v3034_v32  ;;  %v3018_v33 = vsel %vm2149_vm3, %v3016_v0, %v3003_v62 }
 0x45c   : > { %3391 = vmatpush3.bf16.msra.mxu1 %v3052_v51  ;;  %v3146_v49 = vpop.permute.xlu1 %3145 }
 0x45d   : > { %v3005_v60 = vpop.permute.xlu0 %3004  ;;  %3392 = vmatprep.subr.bf16.mxu1 %v3637_v26  ;;  %v3153_v19 = vcombine.low %v3142_v46, %v3146_v49  ;;  %v3154_v56 = vcombine.high %v3142_v46, %v3146_v49 }
 0x45e   : > { %v3020_v37 = vsel %vm2152_vm4, %v3018_v33, %v3005_v60 }
 0x45f   : > { %v3058_v17 = vsel %vm3035_vm7, %v3020_v37, 0  ;;  %v3161_v38 = vrot.slane %v3153_v19, %v5267_v63  ;;  %v3168_v1 = vrot.slane %v3154_v56, %v5267_v63 }
 0x460   : > { %3393 = vmatpush3.bf16.msra.mxu1 %v3058_v17 }
 0x461   : > { %v3144_v28 = vpop.permute.xlu0 %3143 }
 0x463   : > { %3395 = vmatmul.mubr.msk.bf16.vlgmr.msra.gmra.mrb[0].mxu1 %vm438_vm0, %v3054_v42 }
 0x465   : > { %v3148_v15 = vpop.permute.xlu0 %3147 }
 0x466   : > { %v3169_v41 = vcombine.low %v3144_v28, %v3148_v15  ;;  %v3170_v8 = vcombine.high %v3144_v28, %v3148_v15 }
 0x468   : > { %v3177_v29 = vrot.slane %v3169_v41, %v5267_v63  ;;  %v3184_v12 = vrot.slane %v3170_v8, %v5267_v63 }
 0x46a   : > { %v3185_v54 = vcombine.low %v3161_v38, %v3177_v29  ;;  %v3186_v59 = vcombine.high %v3161_v38, %v3177_v29  ;;  %v3201_v6 = vcombine.low %v3168_v1, %v3184_v12  ;;  %v3202_v52 = vcombine.high %v3168_v1, %v3184_v12 }
 0x46c   : > { %v3193_v11 = vrot.slane %v3185_v54, %v3857_v50  ;;  %v3200_v44 = vrot.slane %v3186_v59, %v3857_v50  ;;  %v3209_v40 = vrot.slane %v3201_v6, %v3857_v50  ;;  %v3216_v63 = vrot.slane %v3202_v52, %v3857_v50 }
 0x46d   : > { %v3104_v4 = vpop.permute.xlu1 %3103 }
 0x46e   : > { %v3217_v53 = vcombine.high %v3193_v11, %v3637_v26  ;;  %3226 = vrot.lane.b32.xlu0 %v3200_v44, %s3641_s16  ;;  %v3218_v27 = vcombine.high %v3200_v44, %v3637_v26  ;;  %v3219_v61 = vcombine.high %v3209_v40, %v3637_v26  ;;  %v3220_v24 = vcombine.high %v3216_v63, %v3637_v26  ;;  %s5272_s16 = smov 112  }
 0x470   : > { %3222 = vrot.lane.b32.xlu1 %v3217_v53, %s5269_s18  ;;  %s283_s18 = sand.u32 1, %s3591_s25  }
 0x472   : > { %3234 = vrot.lane.b32.xlu0 %v3209_v40, %s3640_s20  ;;  %s3353_s20 = sshll.u32 %s283_s18, 2 }
 0x473   : > { %s285_s13 = scalar_lea.vmem [#allocation2], %s3353_s20  ;;  %s3646_s20 = smov [#allocation2]  }
 0x474   : > { %3230 = vrot.lane.b32.xlu1 %v3218_v27, %s3642_s9  ;;  %s3383_s9 = sshll.u32 %s3603_s28, 1  ;;  %s3274_s17 = sshll.u32 %s285_s13, 4  ;;  %s5147_s17 = int_to_ptr.vmem [resolvable:$true] %s3274_s17 }
 0x475   : > { %s3270_s22 = sadd.s32 %s3599_s27, %s3383_s9  ;;  %s3259_s27 = scalar_lea.sflag [#allocation3], %s283_s18 }
 0x476   : > { %3242 = vrot.lane.b32.xlu0 %v3216_v63, %s5270_s23  ;;  %v3111_v21 = vpop.permute.xlu0 %3110  ;;  %s3384_s10 = sshll.u32 %s3270_s22, 6  ;;  %s3525_s9 = sshll.u32 %s3646_s20, 4  ;;  %s3526_s9 = int_to_ptr.vmem [resolvable:$false] %s3525_s9 }
 0x477   : > { %s3527_s22 = scalar_lea.vmem %s3526_s9, 128  ;;  %p3528_p2 = scmp.lt.s32.totalorder %s5147_s17, %s3526_s9 }
 0x478   : > { %3238 = vrot.lane.b32.xlu1 %v3219_v61, %s5271_s21  ;;  %s5145_s21 = scalar_lea.hbm %s5205_s7, %s3384_s10 }
 0x47c   : > { %3246 = vrot.lane.b32.xlu1 %v3220_v24, %s5272_s16  ;;  %s3521_s16 = scalar_lea.vmem %s5147_s17, 64 }
 0x47d   : > { %p3522_p13 = scmp.ne.s32.totalorder %s5147_s17, %s3521_s16  ;;  %p3529_p4 = scmp.lt.s32.totalorder %s3527_s22, %s3521_s16 }
 0x47f   : > { %p3523_p0 = pnand %p3522_p13, %p3738_p3  ;;  %p3530_p5 = por %p3529_p4, %p3528_p2 }
 0x481   : > { %p3524_p1 = pneg %p3523_p0 }
 0x483   : > { %p3531_p6 = pnand %p3530_p5, %p3524_p1 }
 0x4e0   : > { %v3227_v20 = vpop.permute.xlu0 %3226 }
 0x4e2   : > { %v3223_v14 = vpop.permute.xlu1 %3222 }
 0x4e3   : > { %v3249_v57 = vsel %vm460_vm6, %v3193_v11, %v3223_v14 }
 0x4e4   : > { %v3235_v3 = vpop.permute.xlu0 %3234  ;;  %v3250_v43 = vsel %vm2137_vm14, %v3249_v57, %v3227_v20 }
 0x4e6   : > { %v3231_v47 = vpop.permute.xlu1 %3230 }
 0x4e7   : > { %v3251_v9 = vsel %vm2140_vm15, %v3250_v43, %v3231_v47 }
 0x4e8   : > { %v3252_v16 = vsel %vm2143_vm1, %v3251_v9, %v3235_v3  ;;  %v3243_v39 = vpop.permute.xlu0 %3242 }
 0x4ea   : > { %v3239_v18 = vpop.permute.xlu1 %3238 }
 0x4eb   : > { %v3253_v13 = vsel %vm2146_vm2, %v3252_v16, %v3239_v18 }
 0x4ec   : > { %v3254_v35 = vsel %vm2149_vm3, %v3253_v13, %v3243_v39 }
 0x4ee   : > { %v3247_v45 = vpop.permute.xlu1 %3246 }
 0x4ef   : > { %v3255_v10 = vsel %vm2152_vm4, %v3254_v35, %v3247_v45 }
 0x536   : > { %v3094_v5 = vpop.f32.mrb[0].mxu1 }
 0x537   : > { %v3106_v34 = vmul.f32 %v3104_v4, %v3094_v5  ;;  %v3396_v25 = vpop.f32.mrb[1].mxu1 }
 0x538   : > { %v3097_v2 = vpop.f32.mrb[2].mxu1 }
 0x539   : > { %v3113_v50 = vadd.f32 %v3111_v21, %v3106_v34  ;;  %v3397_v22 = vpop.f32.mrb[3].mxu1 }
 0x53b   : > { %v3381_v58 = vmul.f32 -1.442695, %v3113_v50 }
 0x53d   : > { %3509 = vpow2.f32 %v3381_v58 }
 0x547   : > { %v3510_v23 = vpop.eup %3509 }
 0x548   : > { %v3117_v26 = vadd.f32 1.0, %v3510_v23 }
 0x54a   : > { %3511 = vrcp.f32 %v3117_v26 }
 0x554   : > { %v3512_v62 = vpop.eup %3511 }
 0x555   : > { %v3120_v7 = vmul.f32 %v3512_v62, %v3113_v50 }
 0x557   : > { %v3256_v36 = vadd.f32 %v3255_v10, %v3120_v7 }
 0x559   : > { %3257 = vst [vmem:[%s285_s13] sm:$0xf] %v3256_v36 }
 0x55a   : > { %3534 = shalt.err (!%p3531_p6)
}
 0x55b   : > { %s3535_s18 = scalar_lea.hbm %s5145_s21, 64  ;;  %s3539_s23 = scalar_lea.hbm %s5205_s7, 256 }
 0x55c   : > { %p3536_p7 = scmp.ne.s32.totalorder %s5145_s21, %s3535_s18  ;;  %p3540_p11 = scmp.lt.u32.totalorder %s5145_s21, %s5205_s7 }
 0x55d   : > { %p3541_p12 = scmp.lt.u32.totalorder %s3539_s23, %s3535_s18  ;;  %p3543_p0 = scmp.lt.u32.totalorder %s3535_s18, %s5145_s21 }
 0x55e   : > { %p3537_p9 = pnand %p3536_p7, %p3738_p3 }
 0x55f   : > { %p3542_p13 = por %p3541_p12, %p3540_p11 }
 0x560   : > { %p3538_p10 = pneg %p3537_p9 }
 0x561   : > { %p3544_p1 = por %p3543_p0, %p3542_p13 }
 0x563   : > { %p3545_p2 = pnand %p3544_p1, %p3538_p10 }
 0x565   : > { %3548 = shalt.err (!%p3545_p2)
}
 0x566   : > { %3399 = dma.vmem_to_hbm [thread:$0]  (%p3738_p3), %s5147_s17, 64, %s5145_s21, %s3259_s27  }
 0x567 PF: > { %p3405_p4 = scmp.ge.s32.totalorder %s3615_s8, 2  ;;  %s3286_s16 = sand.u32 1, %s3587_s24  }
 0x568   : > { %s3287_s9 = scalar_lea.sflag [#allocation3], %s3286_s16 }
 0x569   : > { %p3402_p5 = pnand %p3405_p4, %p3747_p8 }
 0x56b   : > { %3582 = dma.done.wait (!%p3402_p5), %s3287_s9, 64  }
 0x56c   : > { %3584 = vsyncadd (!%p3402_p5), %s3287_s9, 4294967232  ;;  %s20_s8 = sadd.s32 1, %s3615_s8   ;;  %s5273_s24 = smov %s3591_s25 }
 0x56d   : > { %p17_p6 = scmp.ge.s32.totalorder %s20_s8, 6   ;;  %s5274_s25 = smov %s3595_s26 }
 0x56e   : > { %s5275_s26 = smov %s3756_s19  ;;  %s5276_s27 = smov %s3607_s29 }
 0x56f   : > { %s5277_s28 = smov %s3611_s30  ;;  %s5278_s29 = smov %s5281_s11 }
 0x570   : > { %s5279_s30 = smov %s5285_s12  ;;  %19 = sbr.rel (!%p17_p6) target bundleno = 5 (0x5), region = 84 }
 0x577   :  { %3292 = vsyncpa [#allocation3], 1 }
 0x578   :  { %3294 = vsyncpa [#allocation3 + $0x1], 1 }

</bundles_post_ra>
